<compile_context>
chip_gen: v7x
topology: tpu7x:2x2x1
jax: 0.10.0
libtpu: 0.0.40
codegen_flags: <defaults>
</compile_context>

<pallas_src>
import jax
import jax.numpy as jnp
from jax.experimental import pallas as pl
from jax.experimental.pallas import tpu as pltpu


# ----------------------------------------------------------------------------
# Fused kernel factory: num_layers GRU layers + MLP head, all in VMEM.
# Gate order matches torch.nn.GRU: (r, z, n);  n = tanh(i_n + r*(W_hn h + b_hn)).
# ----------------------------------------------------------------------------
def make_fused_gru_mlp_kernel(num_layers, T, B, H):
    n_gru = 4 * num_layers

    def kernel(*refs):
        x_ref = refs[0]                                   # (T*B, D_in), rows = t*B + b
        gru_refs = refs[1:1 + n_gru]                      # per layer: w_ihT, w_hhT, b_ih, b_hh
        fc1_w_ref, fc1_b_ref, fc2_w_ref, fc2_b_ref = refs[1 + n_gru:5 + n_gru]
        out_ref = refs[5 + n_gru]                         # (num_layers*B, H)
        seq_ref = refs[6 + n_gru]                         # VMEM scratch (T*B, H) bf16
        hn_ref = refs[7 + n_gru]                          # VMEM scratch (num_layers*B, H) f32

        x_cur = x_ref[...].astype(jnp.bfloat16)           # bf16 MXU operand
        for l in range(num_layers):
            w_ih_ref, w_hh_ref, b_ih_ref, b_hh_ref = gru_refs[4 * l:4 * l + 4]
            w_hh = w_hh_ref[...]                          # (H, 3H) bf16
            b_hh = b_hh_ref[...]                          # (1, 3H) f32

            # Hoisted input projection: ONE big matmul over all timesteps.
            gi = jnp.dot(x_cur, w_ih_ref[...],
                         preferred_element_type=jnp.float32) + b_ih_ref[...]   # (T*B, 3H) f32

            h = jnp.zeros((B, H), jnp.float32)
            for t in range(T):                            # static unroll (T small & static)
                gh = jnp.dot(h.astype(jnp.bfloat16), w_hh,
                             preferred_element_type=jnp.float32) + b_hh        # (B, 3H) f32
                gi_t = gi[t * B:(t + 1) * B, :]
                i_r, i_z, i_n = gi_t[:, :H], gi_t[:, H:2 * H], gi_t[:, 2 * H:]
                h_r, h_z, h_n = gh[:, :H], gh[:, H:2 * H], gh[:, 2 * H:]
                r = jax.nn.sigmoid(i_r + h_r)
                z = jax.nn.sigmoid(i_z + h_z)
                n = jnp.tanh(i_n + r * h_n)
                h = (1.0 - z) * n + z * h                 # f32 elementwise (v5e-safe)
                if l + 1 < num_layers:
                    seq_ref[t * B:(t + 1) * B, :] = h.astype(seq_ref.dtype)
            hn_ref[l * B:(l + 1) * B, :] = h              # layer-major == hn.view(-1, H)
            if l + 1 < num_layers:
                x_cur = seq_ref[...]                      # feed next layer (bf16, in VMEM)

        # ---- MLP head: relu -> fc_1 -> relu -> fc  (dr_rate == 0 path) ----
        # TODO(synk): dropout (dr_rate > 0) is not implemented; reference is run with dr_rate=0.
        a = jnp.maximum(hn_ref[...], 0.0)
        z1 = jnp.dot(a.astype(jnp.bfloat16), fc1_w_ref[...],
                     preferred_element_type=jnp.float32) + fc1_b_ref[...]
        z1 = jnp.maximum(z1, 0.0)
        out = jnp.dot(z1.astype(jnp.bfloat16), fc2_w_ref[...],
                      preferred_element_type=jnp.float32) + fc2_b_ref[...]
        out_ref[...] = out.astype(out_ref.dtype)

    return kernel


# ----------------------------------------------------------------------------
# Parameters (PyTorch-native layout) + one-time kernel-layout preparation
# ----------------------------------------------------------------------------
def init_params(key, input_size, hidden_size, num_layers, fc_mid=2048):
    params = {"gru": []}
    k = 1.0 / jnp.sqrt(hidden_size)
    keys = jax.random.split(key, num_layers * 4 + 4)
    ki = 0
    for layer in range(num_layers):
        d_in = input_size if layer == 0 else hidden_size
        w_ih = jax.random.uniform(keys[ki], (3 * hidden_size, d_in), jnp.float32, -k, k); ki += 1
        w_hh = jax.random.uniform(keys[ki], (3 * hidden_size, hidden_size), jnp.float32, -k, k); ki += 1
        b_ih = jax.random.uniform(keys[ki], (3 * hidden_size,), jnp.float32, -k, k); ki += 1
        b_hh = jax.random.uniform(keys[ki], (3 * hidden_size,), jnp.float32, -k, k); ki += 1
        params["gru"].append((w_ih, w_hh, b_ih, b_hh))
    k1 = 1.0 / jnp.sqrt(hidden_size)
    params["fc1_w"] = jax.random.uniform(keys[ki], (fc_mid, hidden_size), jnp.float32, -k1, k1); ki += 1
    params["fc1_b"] = jax.random.uniform(keys[ki], (fc_mid,), jnp.float32, -k1, k1); ki += 1
    k2 = 1.0 / jnp.sqrt(fc_mid)
    params["fc2_w"] = jax.random.uniform(keys[ki], (hidden_size, fc_mid), jnp.float32, -k2, k2); ki += 1
    params["fc2_b"] = jax.random.uniform(keys[ki], (hidden_size,), jnp.float32, -k2, k2); ki += 1
    return params


def prepare_params(params):
    """One-time layout prep (hoisted out of the per-forward path):
    transpose weights to (in, out), pre-cast matmul operands to bf16,
    reshape biases to (1, out) f32."""
    prepped = {"gru": []}
    for (w_ih, w_hh, b_ih, b_hh) in params["gru"]:
        prepped["gru"].append((
            jnp.transpose(w_ih).astype(jnp.bfloat16),      # (D_in, 3H)
            jnp.transpose(w_hh).astype(jnp.bfloat16),      # (H, 3H)
            b_ih.reshape(1, -1).astype(jnp.float32),
            b_hh.reshape(1, -1).astype(jnp.float32),
        ))
    prepped["fc1_w"] = jnp.transpose(params["fc1_w"]).astype(jnp.bfloat16)   # (H, 2048)
    prepped["fc1_b"] = params["fc1_b"].reshape(1, -1).astype(jnp.float32)
    prepped["fc2_w"] = jnp.transpose(params["fc2_w"]).astype(jnp.bfloat16)   # (2048, H)
    prepped["fc2_b"] = params["fc2_b"].reshape(1, -1).astype(jnp.float32)
    return prepped


# ----------------------------------------------------------------------------
# Forward: one pallas_call for the whole module
# ----------------------------------------------------------------------------
@jax.jit
def _forward_jit(prepped, x):
    B, T, D = x.shape
    num_layers = len(prepped["gru"])
    H = prepped["gru"][0][1].shape[0]                      # w_hh_T: (H, 3H)
    # batch_first -> time-major 2-D (rows = t*B + b); only per-forward layout op left.
    x_tm = jnp.transpose(x, (1, 0, 2)).reshape(T * B, D)

    flat = [x_tm]
    for layer in prepped["gru"]:
        flat.extend(layer)
    flat += [prepped["fc1_w"], prepped["fc1_b"], prepped["fc2_w"], prepped["fc2_b"]]

    out = pl.pallas_call(
        make_fused_gru_mlp_kernel(num_layers, T, B, H),
        out_shape=jax.ShapeDtypeStruct((num_layers * B, H), jnp.float32),
        in_specs=[pl.BlockSpec(memory_space=pltpu.VMEM)] * len(flat),
        out_specs=pl.BlockSpec(memory_space=pltpu.VMEM),
        scratch_shapes=[
            pltpu.VMEM((T * B, H), jnp.bfloat16),             # inter-layer activations
            pltpu.VMEM((num_layers * B, H), jnp.float32),     # stacked final hidden states
        ],
    )(*flat)
    return out


def gru_model_forward(prepped, x, seq_num=None):
    """x: (B, T, input_size) — batch_first, matching the PyTorch module."""
    del seq_num  # unused by the reference forward as well
    return _forward_jit(prepped, x)


# ----------------------------------------------------------------------------
# Pure-JAX reference (same bf16-operand / f32-accumulate matmul policy)
# ----------------------------------------------------------------------------
def _bf16_dot(a, b):
    return jnp.dot(a.astype(jnp.bfloat16), b.astype(jnp.bfloat16),
                   preferred_element_type=jnp.float32)


def gru_model_ref(params, x):
    B, T, _ = x.shape
    inp = x
    hns = []
    for (w_ih, w_hh, b_ih, b_hh) in params["gru"]:
        H = w_hh.shape[1]
        h = jnp.zeros((B, H), jnp.float32)
        ys = []
        for t in range(T):
            gi = _bf16_dot(inp[:, t, :], w_ih.T) + b_ih
            gh = _bf16_dot(h, w_hh.T) + b_hh
            i_r, i_z, i_n = gi[:, :H], gi[:, H:2 * H], gi[:, 2 * H:]
            h_r, h_z, h_n = gh[:, :H], gh[:, H:2 * H], gh[:, 2 * H:]
            r = jax.nn.sigmoid(i_r + h_r)
            z = jax.nn.sigmoid(i_z + h_z)
            n = jnp.tanh(i_n + r * h_n)
            h = (1.0 - z) * n + z * h
            ys.append(h)
        inp = jnp.stack(ys, axis=1)
        hns.append(h)
    hn_all = jnp.concatenate(hns, axis=0)
    out = _bf16_dot(jnp.maximum(hn_all, 0.0), params["fc1_w"].T) + params["fc1_b"]
    out = _bf16_dot(jnp.maximum(out, 0.0), params["fc2_w"].T) + params["fc2_b"]
    return out


if __name__ == "__main__":
    # Shapes consistent with the module: batch=2, seq=8, input=8, hidden=32,
    # num_layers=2, dr_rate=0 (dropout disabled), fc mid width 2048.
    batch, seq_length, input_size, hidden_size, num_layers = 2, 8, 8, 32, 2

    key = jax.random.PRNGKey(0)
    k_param, k_x = jax.random.split(key)
    params = init_params(k_param, input_size, hidden_size, num_layers)
    prepped = prepare_params(params)
    x = jax.random.normal(k_x, (batch, seq_length, input_size), jnp.float32)

    out = gru_model_forward(prepped, x, seq_num=seq_length)
    out = jax.block_until_ready(out)

    ref = gru_model_ref(params, x)
    assert out.shape == (num_layers * batch, hidden_size), out.shape
    max_err = float(jnp.max(jnp.abs(out - ref)))
    assert jnp.allclose(out, ref, atol=2e-3, rtol=2e-3), max_err

    print("KERNEL_OK")
</pallas_src>

<mosaic_0001>
module attributes {stable_mosaic.version = 11 : i64} {
  func.func @kernel(%arg0: memref<16x8xf32, #tpu.memory_space<vmem>>, %arg1: memref<8x96xbf16, #tpu.memory_space<vmem>>, %arg2: memref<32x96xbf16, #tpu.memory_space<vmem>>, %arg3: memref<1x96xf32, #tpu.memory_space<vmem>>, %arg4: memref<1x96xf32, #tpu.memory_space<vmem>>, %arg5: memref<32x96xbf16, #tpu.memory_space<vmem>>, %arg6: memref<32x96xbf16, #tpu.memory_space<vmem>>, %arg7: memref<1x96xf32, #tpu.memory_space<vmem>>, %arg8: memref<1x96xf32, #tpu.memory_space<vmem>>, %arg9: memref<32x2048xbf16, #tpu.memory_space<vmem>>, %arg10: memref<1x2048xf32, #tpu.memory_space<vmem>>, %arg11: memref<2048x32xbf16, #tpu.memory_space<vmem>>, %arg12: memref<1x32xf32, #tpu.memory_space<vmem>>, %arg13: memref<4x32xf32, #tpu.memory_space<vmem>>, %arg14: memref<16x32xbf16, #tpu.memory_space<vmem>>, %arg15: memref<4x32xf32, #tpu.memory_space<vmem>>) attributes {dimension_semantics = [], scalar_prefetch = 0 : i64, scratch_operands = 2 : i64, tpu.core_type = #tpu.core_type<tc>} {
    %c0 = arith.constant 0 : index
    %c0_0 = arith.constant 0 : index
    %0 = vector.load %arg0[%c0, %c0_0] : memref<16x8xf32, #tpu.memory_space<vmem>>, vector<16x8xf32>
    %1 = arith.truncf %0 : vector<16x8xf32> to vector<16x8xbf16>
    %c0_1 = arith.constant 0 : index
    %c0_2 = arith.constant 0 : index
    %2 = vector.load %arg2[%c0_1, %c0_2] : memref<32x96xbf16, #tpu.memory_space<vmem>>, vector<32x96xbf16>
    %c0_3 = arith.constant 0 : index
    %c0_4 = arith.constant 0 : index
    %3 = vector.load %arg4[%c0_3, %c0_4] : memref<1x96xf32, #tpu.memory_space<vmem>>, vector<1x96xf32>
    %c0_5 = arith.constant 0 : index
    %c0_6 = arith.constant 0 : index
    %4 = vector.load %arg1[%c0_5, %c0_6] : memref<8x96xbf16, #tpu.memory_space<vmem>>, vector<8x96xbf16>
    %cst = arith.constant dense<0.000000e+00> : vector<16x96xf32>
    %5 = tpu.matmul %1, %4, %cst {dimension_numbers = #tpu.dot_dimension_numbers<[1], [0], [0], [1], [0, 0, 1, 1], [], []>} : vector<16x8xbf16>, vector<8x96xbf16>, vector<16x96xf32> -> vector<16x96xf32>
    %c0_7 = arith.constant 0 : index
    %c0_8 = arith.constant 0 : index
    %6 = vector.load %arg3[%c0_7, %c0_8] : memref<1x96xf32, #tpu.memory_space<vmem>>, vector<1x96xf32>
    %7 = vector.broadcast %6 : vector<1x96xf32> to vector<16x96xf32>
    %8 = arith.addf %5, %7 : vector<16x96xf32>
    %cst_9 = arith.constant 0.000000e+00 : f32
    %9 = vector.broadcast %cst_9 : f32 to vector<2x32xf32>
    %10 = arith.truncf %9 : vector<2x32xf32> to vector<2x32xbf16>
    %cst_10 = arith.constant dense<0.000000e+00> : vector<2x96xf32>
    %11 = tpu.matmul %10, %2, %cst_10 {dimension_numbers = #tpu.dot_dimension_numbers<[1], [0], [0], [1], [0, 0, 1, 1], [], []>} : vector<2x32xbf16>, vector<32x96xbf16>, vector<2x96xf32> -> vector<2x96xf32>
    %12 = vector.broadcast %3 : vector<1x96xf32> to vector<2x96xf32>
    %13 = arith.addf %11, %12 : vector<2x96xf32>
    %14 = vector.extract_strided_slice %8 {offsets = [0, 0], sizes = [2, 96], strides = [1, 1]} : vector<16x96xf32> to vector<2x96xf32>
    %15 = vector.extract_strided_slice %14 {offsets = [0, 0], sizes = [2, 32], strides = [1, 1]} : vector<2x96xf32> to vector<2x32xf32>
    %16 = vector.extract_strided_slice %14 {offsets = [0, 32], sizes = [2, 32], strides = [1, 1]} : vector<2x96xf32> to vector<2x32xf32>
    %17 = vector.extract_strided_slice %14 {offsets = [0, 64], sizes = [2, 32], strides = [1, 1]} : vector<2x96xf32> to vector<2x32xf32>
    %18 = vector.extract_strided_slice %13 {offsets = [0, 0], sizes = [2, 32], strides = [1, 1]} : vector<2x96xf32> to vector<2x32xf32>
    %19 = vector.extract_strided_slice %13 {offsets = [0, 32], sizes = [2, 32], strides = [1, 1]} : vector<2x96xf32> to vector<2x32xf32>
    %20 = vector.extract_strided_slice %13 {offsets = [0, 64], sizes = [2, 32], strides = [1, 1]} : vector<2x96xf32> to vector<2x32xf32>
    %21 = arith.addf %15, %18 : vector<2x32xf32>
    %22 = arith.negf %21 : vector<2x32xf32>
    %23 = math.exp %22 : vector<2x32xf32>
    %cst_11 = arith.constant 1.000000e+00 : f32
    %24 = vector.broadcast %cst_11 : f32 to vector<2x32xf32>
    %25 = arith.addf %24, %23 : vector<2x32xf32>
    %26 = arith.divf %24, %25 : vector<2x32xf32>
    %27 = arith.addf %16, %19 : vector<2x32xf32>
    %28 = arith.negf %27 : vector<2x32xf32>
    %29 = math.exp %28 : vector<2x32xf32>
    %cst_12 = arith.constant 1.000000e+00 : f32
    %30 = vector.broadcast %cst_12 : f32 to vector<2x32xf32>
    %31 = arith.addf %30, %29 : vector<2x32xf32>
    %32 = arith.divf %30, %31 : vector<2x32xf32>
    %33 = arith.mulf %26, %20 : vector<2x32xf32>
    %34 = arith.addf %17, %33 : vector<2x32xf32>
    %35 = math.tanh %34 : vector<2x32xf32>
    %cst_13 = arith.constant 1.000000e+00 : f32
    %36 = vector.broadcast %cst_13 : f32 to vector<2x32xf32>
    %37 = arith.subf %36, %32 : vector<2x32xf32>
    %38 = arith.mulf %37, %35 : vector<2x32xf32>
    %39 = arith.mulf %32, %9 : vector<2x32xf32>
    %40 = arith.addf %38, %39 : vector<2x32xf32>
    %41 = arith.truncf %40 : vector<2x32xf32> to vector<2x32xbf16>
    %c0_14 = arith.constant 0 : index
    %c0_15 = arith.constant 0 : index
    %42 = vector.load %arg14[%c0_14, %c0_15] : memref<16x32xbf16, #tpu.memory_space<vmem>>, vector<2x32xbf16>
    tpu.vector_store %arg14[%c0_14, %c0_15], %41 {strides = array<i32>} : memref<16x32xbf16, #tpu.memory_space<vmem>>, vector<2x32xbf16>,
    %43 = arith.truncf %40 : vector<2x32xf32> to vector<2x32xbf16>
    %cst_16 = arith.constant dense<0.000000e+00> : vector<2x96xf32>
    %44 = tpu.matmul %43, %2, %cst_16 {dimension_numbers = #tpu.dot_dimension_numbers<[1], [0], [0], [1], [0, 0, 1, 1], [], []>} : vector<2x32xbf16>, vector<32x96xbf16>, vector<2x96xf32> -> vector<2x96xf32>
    %45 = vector.broadcast %3 : vector<1x96xf32> to vector<2x96xf32>
    %46 = arith.addf %44, %45 : vector<2x96xf32>
    %47 = vector.extract_strided_slice %8 {offsets = [2, 0], sizes = [2, 96], strides = [1, 1]} : vector<16x96xf32> to vector<2x96xf32>
    %48 = vector.extract_strided_slice %47 {offsets = [0, 0], sizes = [2, 32], strides = [1, 1]} : vector<2x96xf32> to vector<2x32xf32>
    %49 = vector.extract_strided_slice %47 {offsets = [0, 32], sizes = [2, 32], strides = [1, 1]} : vector<2x96xf32> to vector<2x32xf32>
    %50 = vector.extract_strided_slice %47 {offsets = [0, 64], sizes = [2, 32], strides = [1, 1]} : vector<2x96xf32> to vector<2x32xf32>
    %51 = vector.extract_strided_slice %46 {offsets = [0, 0], sizes = [2, 32], strides = [1, 1]} : vector<2x96xf32> to vector<2x32xf32>
    %52 = vector.extract_strided_slice %46 {offsets = [0, 32], sizes = [2, 32], strides = [1, 1]} : vector<2x96xf32> to vector<2x32xf32>
    %53 = vector.extract_strided_slice %46 {offsets = [0, 64], sizes = [2, 32], strides = [1, 1]} : vector<2x96xf32> to vector<2x32xf32>
    %54 = arith.addf %48, %51 : vector<2x32xf32>
    %55 = arith.negf %54 : vector<2x32xf32>
    %56 = math.exp %55 : vector<2x32xf32>
    %cst_17 = arith.constant 1.000000e+00 : f32
    %57 = vector.broadcast %cst_17 : f32 to vector<2x32xf32>
    %58 = arith.addf %57, %56 : vector<2x32xf32>
    %59 = arith.divf %57, %58 : vector<2x32xf32>
    %60 = arith.addf %49, %52 : vector<2x32xf32>
    %61 = arith.negf %60 : vector<2x32xf32>
    %62 = math.exp %61 : vector<2x32xf32>
    %cst_18 = arith.constant 1.000000e+00 : f32
    %63 = vector.broadcast %cst_18 : f32 to vector<2x32xf32>
    %64 = arith.addf %63, %62 : vector<2x32xf32>
    %65 = arith.divf %63, %64 : vector<2x32xf32>
    %66 = arith.mulf %59, %53 : vector<2x32xf32>
    %67 = arith.addf %50, %66 : vector<2x32xf32>
    %68 = math.tanh %67 : vector<2x32xf32>
    %cst_19 = arith.constant 1.000000e+00 : f32
    %69 = vector.broadcast %cst_19 : f32 to vector<2x32xf32>
    %70 = arith.subf %69, %65 : vector<2x32xf32>
    %71 = arith.mulf %70, %68 : vector<2x32xf32>
    %72 = arith.mulf %65, %40 : vector<2x32xf32>
    %73 = arith.addf %71, %72 : vector<2x32xf32>
    %74 = arith.truncf %73 : vector<2x32xf32> to vector<2x32xbf16>
    %c2 = arith.constant 2 : index
    %c0_20 = arith.constant 0 : index
    %75 = vector.load %arg14[%c2, %c0_20] : memref<16x32xbf16, #tpu.memory_space<vmem>>, vector<2x32xbf16>
    tpu.vector_store %arg14[%c2, %c0_20], %74 {strides = array<i32>} : memref<16x32xbf16, #tpu.memory_space<vmem>>, vector<2x32xbf16>,
    %76 = arith.truncf %73 : vector<2x32xf32> to vector<2x32xbf16>
    %cst_21 = arith.constant dense<0.000000e+00> : vector<2x96xf32>
    %77 = tpu.matmul %76, %2, %cst_21 {dimension_numbers = #tpu.dot_dimension_numbers<[1], [0], [0], [1], [0, 0, 1, 1], [], []>} : vector<2x32xbf16>, vector<32x96xbf16>, vector<2x96xf32> -> vector<2x96xf32>
    %78 = vector.broadcast %3 : vector<1x96xf32> to vector<2x96xf32>
    %79 = arith.addf %77, %78 : vector<2x96xf32>
    %80 = vector.extract_strided_slice %8 {offsets = [4, 0], sizes = [2, 96], strides = [1, 1]} : vector<16x96xf32> to vector<2x96xf32>
    %81 = vector.extract_strided_slice %80 {offsets = [0, 0], sizes = [2, 32], strides = [1, 1]} : vector<2x96xf32> to vector<2x32xf32>
    %82 = vector.extract_strided_slice %80 {offsets = [0, 32], sizes = [2, 32], strides = [1, 1]} : vector<2x96xf32> to vector<2x32xf32>
    %83 = vector.extract_strided_slice %80 {offsets = [0, 64], sizes = [2, 32], strides = [1, 1]} : vector<2x96xf32> to vector<2x32xf32>
    %84 = vector.extract_strided_slice %79 {offsets = [0, 0], sizes = [2, 32], strides = [1, 1]} : vector<2x96xf32> to vector<2x32xf32>
    %85 = vector.extract_strided_slice %79 {offsets = [0, 32], sizes = [2, 32], strides = [1, 1]} : vector<2x96xf32> to vector<2x32xf32>
    %86 = vector.extract_strided_slice %79 {offsets = [0, 64], sizes = [2, 32], strides = [1, 1]} : vector<2x96xf32> to vector<2x32xf32>
    %87 = arith.addf %81, %84 : vector<2x32xf32>
    %88 = arith.negf %87 : vector<2x32xf32>
    %89 = math.exp %88 : vector<2x32xf32>
    %cst_22 = arith.constant 1.000000e+00 : f32
    %90 = vector.broadcast %cst_22 : f32 to vector<2x32xf32>
    %91 = arith.addf %90, %89 : vector<2x32xf32>
    %92 = arith.divf %90, %91 : vector<2x32xf32>
    %93 = arith.addf %82, %85 : vector<2x32xf32>
    %94 = arith.negf %93 : vector<2x32xf32>
    %95 = math.exp %94 : vector<2x32xf32>
    %cst_23 = arith.constant 1.000000e+00 : f32
    %96 = vector.broadcast %cst_23 : f32 to vector<2x32xf32>
    %97 = arith.addf %96, %95 : vector<2x32xf32>
    %98 = arith.divf %96, %97 : vector<2x32xf32>
    %99 = arith.mulf %92, %86 : vector<2x32xf32>
    %100 = arith.addf %83, %99 : vector<2x32xf32>
    %101 = math.tanh %100 : vector<2x32xf32>
    %cst_24 = arith.constant 1.000000e+00 : f32
    %102 = vector.broadcast %cst_24 : f32 to vector<2x32xf32>
    %103 = arith.subf %102, %98 : vector<2x32xf32>
    %104 = arith.mulf %103, %101 : vector<2x32xf32>
    %105 = arith.mulf %98, %73 : vector<2x32xf32>
    %106 = arith.addf %104, %105 : vector<2x32xf32>
    %107 = arith.truncf %106 : vector<2x32xf32> to vector<2x32xbf16>
    %c4 = arith.constant 4 : index
    %c0_25 = arith.constant 0 : index
    %108 = vector.load %arg14[%c4, %c0_25] : memref<16x32xbf16, #tpu.memory_space<vmem>>, vector<2x32xbf16>
    tpu.vector_store %arg14[%c4, %c0_25], %107 {strides = array<i32>} : memref<16x32xbf16, #tpu.memory_space<vmem>>, vector<2x32xbf16>,
    %109 = arith.truncf %106 : vector<2x32xf32> to vector<2x32xbf16>
    %cst_26 = arith.constant dense<0.000000e+00> : vector<2x96xf32>
    %110 = tpu.matmul %109, %2, %cst_26 {dimension_numbers = #tpu.dot_dimension_numbers<[1], [0], [0], [1], [0, 0, 1, 1], [], []>} : vector<2x32xbf16>, vector<32x96xbf16>, vector<2x96xf32> -> vector<2x96xf32>
    %111 = vector.broadcast %3 : vector<1x96xf32> to vector<2x96xf32>
    %112 = arith.addf %110, %111 : vector<2x96xf32>
    %113 = vector.extract_strided_slice %8 {offsets = [6, 0], sizes = [2, 96], strides = [1, 1]} : vector<16x96xf32> to vector<2x96xf32>
    %114 = vector.extract_strided_slice %113 {offsets = [0, 0], sizes = [2, 32], strides = [1, 1]} : vector<2x96xf32> to vector<2x32xf32>
    %115 = vector.extract_strided_slice %113 {offsets = [0, 32], sizes = [2, 32], strides = [1, 1]} : vector<2x96xf32> to vector<2x32xf32>
    %116 = vector.extract_strided_slice %113 {offsets = [0, 64], sizes = [2, 32], strides = [1, 1]} : vector<2x96xf32> to vector<2x32xf32>
    %117 = vector.extract_strided_slice %112 {offsets = [0, 0], sizes = [2, 32], strides = [1, 1]} : vector<2x96xf32> to vector<2x32xf32>
    %118 = vector.extract_strided_slice %112 {offsets = [0, 32], sizes = [2, 32], strides = [1, 1]} : vector<2x96xf32> to vector<2x32xf32>
    %119 = vector.extract_strided_slice %112 {offsets = [0, 64], sizes = [2, 32], strides = [1, 1]} : vector<2x96xf32> to vector<2x32xf32>
    %120 = arith.addf %114, %117 : vector<2x32xf32>
    %121 = arith.negf %120 : vector<2x32xf32>
    %122 = math.exp %121 : vector<2x32xf32>
    %cst_27 = arith.constant 1.000000e+00 : f32
    %123 = vector.broadcast %cst_27 : f32 to vector<2x32xf32>
    %124 = arith.addf %123, %122 : vector<2x32xf32>
    %125 = arith.divf %123, %124 : vector<2x32xf32>
    %126 = arith.addf %115, %118 : vector<2x32xf32>
    %127 = arith.negf %126 : vector<2x32xf32>
    %128 = math.exp %127 : vector<2x32xf32>
    %cst_28 = arith.constant 1.000000e+00 : f32
    %129 = vector.broadcast %cst_28 : f32 to vector<2x32xf32>
    %130 = arith.addf %129, %128 : vector<2x32xf32>
    %131 = arith.divf %129, %130 : vector<2x32xf32>
    %132 = arith.mulf %125, %119 : vector<2x32xf32>
    %133 = arith.addf %116, %132 : vector<2x32xf32>
    %134 = math.tanh %133 : vector<2x32xf32>
    %cst_29 = arith.constant 1.000000e+00 : f32
    %135 = vector.broadcast %cst_29 : f32 to vector<2x32xf32>
    %136 = arith.subf %135, %131 : vector<2x32xf32>
    %137 = arith.mulf %136, %134 : vector<2x32xf32>
    %138 = arith.mulf %131, %106 : vector<2x32xf32>
    %139 = arith.addf %137, %138 : vector<2x32xf32>
    %140 = arith.truncf %139 : vector<2x32xf32> to vector<2x32xbf16>
    %c6 = arith.constant 6 : index
    %c0_30 = arith.constant 0 : index
    %141 = vector.load %arg14[%c6, %c0_30] : memref<16x32xbf16, #tpu.memory_space<vmem>>, vector<2x32xbf16>
    tpu.vector_store %arg14[%c6, %c0_30], %140 {strides = array<i32>} : memref<16x32xbf16, #tpu.memory_space<vmem>>, vector<2x32xbf16>,
    %142 = arith.truncf %139 : vector<2x32xf32> to vector<2x32xbf16>
    %cst_31 = arith.constant dense<0.000000e+00> : vector<2x96xf32>
    %143 = tpu.matmul %142, %2, %cst_31 {dimension_numbers = #tpu.dot_dimension_numbers<[1], [0], [0], [1], [0, 0, 1, 1], [], []>} : vector<2x32xbf16>, vector<32x96xbf16>, vector<2x96xf32> -> vector<2x96xf32>
    %144 = vector.broadcast %3 : vector<1x96xf32> to vector<2x96xf32>
    %145 = arith.addf %143, %144 : vector<2x96xf32>
    %146 = vector.extract_strided_slice %8 {offsets = [8, 0], sizes = [2, 96], strides = [1, 1]} : vector<16x96xf32> to vector<2x96xf32>
    %147 = vector.extract_strided_slice %146 {offsets = [0, 0], sizes = [2, 32], strides = [1, 1]} : vector<2x96xf32> to vector<2x32xf32>
    %148 = vector.extract_strided_slice %146 {offsets = [0, 32], sizes = [2, 32], strides = [1, 1]} : vector<2x96xf32> to vector<2x32xf32>
    %149 = vector.extract_strided_slice %146 {offsets = [0, 64], sizes = [2, 32], strides = [1, 1]} : vector<2x96xf32> to vector<2x32xf32>
    %150 = vector.extract_strided_slice %145 {offsets = [0, 0], sizes = [2, 32], strides = [1, 1]} : vector<2x96xf32> to vector<2x32xf32>
    %151 = vector.extract_strided_slice %145 {offsets = [0, 32], sizes = [2, 32], strides = [1, 1]} : vector<2x96xf32> to vector<2x32xf32>
    %152 = vector.extract_strided_slice %145 {offsets = [0, 64], sizes = [2, 32], strides = [1, 1]} : vector<2x96xf32> to vector<2x32xf32>
    %153 = arith.addf %147, %150 : vector<2x32xf32>
    %154 = arith.negf %153 : vector<2x32xf32>
    %155 = math.exp %154 : vector<2x32xf32>
    %cst_32 = arith.constant 1.000000e+00 : f32
    %156 = vector.broadcast %cst_32 : f32 to vector<2x32xf32>
    %157 = arith.addf %156, %155 : vector<2x32xf32>
    %158 = arith.divf %156, %157 : vector<2x32xf32>
    %159 = arith.addf %148, %151 : vector<2x32xf32>
    %160 = arith.negf %159 : vector<2x32xf32>
    %161 = math.exp %160 : vector<2x32xf32>
    %cst_33 = arith.constant 1.000000e+00 : f32
    %162 = vector.broadcast %cst_33 : f32 to vector<2x32xf32>
    %163 = arith.addf %162, %161 : vector<2x32xf32>
    %164 = arith.divf %162, %163 : vector<2x32xf32>
    %165 = arith.mulf %158, %152 : vector<2x32xf32>
    %166 = arith.addf %149, %165 : vector<2x32xf32>
    %167 = math.tanh %166 : vector<2x32xf32>
    %cst_34 = arith.constant 1.000000e+00 : f32
    %168 = vector.broadcast %cst_34 : f32 to vector<2x32xf32>
    %169 = arith.subf %168, %164 : vector<2x32xf32>
    %170 = arith.mulf %169, %167 : vector<2x32xf32>
    %171 = arith.mulf %164, %139 : vector<2x32xf32>
    %172 = arith.addf %170, %171 : vector<2x32xf32>
    %173 = arith.truncf %172 : vector<2x32xf32> to vector<2x32xbf16>
    %c8 = arith.constant 8 : index
    %c0_35 = arith.constant 0 : index
    %174 = vector.load %arg14[%c8, %c0_35] : memref<16x32xbf16, #tpu.memory_space<vmem>>, vector<2x32xbf16>
    tpu.vector_store %arg14[%c8, %c0_35], %173 {strides = array<i32>} : memref<16x32xbf16, #tpu.memory_space<vmem>>, vector<2x32xbf16>,
    %175 = arith.truncf %172 : vector<2x32xf32> to vector<2x32xbf16>
    %cst_36 = arith.constant dense<0.000000e+00> : vector<2x96xf32>
    %176 = tpu.matmul %175, %2, %cst_36 {dimension_numbers = #tpu.dot_dimension_numbers<[1], [0], [0], [1], [0, 0, 1, 1], [], []>} : vector<2x32xbf16>, vector<32x96xbf16>, vector<2x96xf32> -> vector<2x96xf32>
    %177 = vector.broadcast %3 : vector<1x96xf32> to vector<2x96xf32>
    %178 = arith.addf %176, %177 : vector<2x96xf32>
    %179 = vector.extract_strided_slice %8 {offsets = [10, 0], sizes = [2, 96], strides = [1, 1]} : vector<16x96xf32> to vector<2x96xf32>
    %180 = vector.extract_strided_slice %179 {offsets = [0, 0], sizes = [2, 32], strides = [1, 1]} : vector<2x96xf32> to vector<2x32xf32>
    %181 = vector.extract_strided_slice %179 {offsets = [0, 32], sizes = [2, 32], strides = [1, 1]} : vector<2x96xf32> to vector<2x32xf32>
    %182 = vector.extract_strided_slice %179 {offsets = [0, 64], sizes = [2, 32], strides = [1, 1]} : vector<2x96xf32> to vector<2x32xf32>
    %183 = vector.extract_strided_slice %178 {offsets = [0, 0], sizes = [2, 32], strides = [1, 1]} : vector<2x96xf32> to vector<2x32xf32>
    %184 = vector.extract_strided_slice %178 {offsets = [0, 32], sizes = [2, 32], strides = [1, 1]} : vector<2x96xf32> to vector<2x32xf32>
    %185 = vector.extract_strided_slice %178 {offsets = [0, 64], sizes = [2, 32], strides = [1, 1]} : vector<2x96xf32> to vector<2x32xf32>
    %186 = arith.addf %180, %183 : vector<2x32xf32>
    %187 = arith.negf %186 : vector<2x32xf32>
    %188 = math.exp %187 : vector<2x32xf32>
    %cst_37 = arith.constant 1.000000e+00 : f32
    %189 = vector.broadcast %cst_37 : f32 to vector<2x32xf32>
    %190 = arith.addf %189, %188 : vector<2x32xf32>
    %191 = arith.divf %189, %190 : vector<2x32xf32>
    %192 = arith.addf %181, %184 : vector<2x32xf32>
    %193 = arith.negf %192 : vector<2x32xf32>
    %194 = math.exp %193 : vector<2x32xf32>
    %cst_38 = arith.constant 1.000000e+00 : f32
    %195 = vector.broadcast %cst_38 : f32 to vector<2x32xf32>
    %196 = arith.addf %195, %194 : vector<2x32xf32>
    %197 = arith.divf %195, %196 : vector<2x32xf32>
    %198 = arith.mulf %191, %185 : vector<2x32xf32>
    %199 = arith.addf %182, %198 : vector<2x32xf32>
    %200 = math.tanh %199 : vector<2x32xf32>
    %cst_39 = arith.constant 1.000000e+00 : f32
    %201 = vector.broadcast %cst_39 : f32 to vector<2x32xf32>
    %202 = arith.subf %201, %197 : vector<2x32xf32>
    %203 = arith.mulf %202, %200 : vector<2x32xf32>
    %204 = arith.mulf %197, %172 : vector<2x32xf32>
    %205 = arith.addf %203, %204 : vector<2x32xf32>
    %206 = arith.truncf %205 : vector<2x32xf32> to vector<2x32xbf16>
    %c10 = arith.constant 10 : index
    %c0_40 = arith.constant 0 : index
    %207 = vector.load %arg14[%c10, %c0_40] : memref<16x32xbf16, #tpu.memory_space<vmem>>, vector<2x32xbf16>
    tpu.vector_store %arg14[%c10, %c0_40], %206 {strides = array<i32>} : memref<16x32xbf16, #tpu.memory_space<vmem>>, vector<2x32xbf16>,
    %208 = arith.truncf %205 : vector<2x32xf32> to vector<2x32xbf16>
    %cst_41 = arith.constant dense<0.000000e+00> : vector<2x96xf32>
    %209 = tpu.matmul %208, %2, %cst_41 {dimension_numbers = #tpu.dot_dimension_numbers<[1], [0], [0], [1], [0, 0, 1, 1], [], []>} : vector<2x32xbf16>, vector<32x96xbf16>, vector<2x96xf32> -> vector<2x96xf32>
    %210 = vector.broadcast %3 : vector<1x96xf32> to vector<2x96xf32>
    %211 = arith.addf %209, %210 : vector<2x96xf32>
    %212 = vector.extract_strided_slice %8 {offsets = [12, 0], sizes = [2, 96], strides = [1, 1]} : vector<16x96xf32> to vector<2x96xf32>
    %213 = vector.extract_strided_slice %212 {offsets = [0, 0], sizes = [2, 32], strides = [1, 1]} : vector<2x96xf32> to vector<2x32xf32>
    %214 = vector.extract_strided_slice %212 {offsets = [0, 32], sizes = [2, 32], strides = [1, 1]} : vector<2x96xf32> to vector<2x32xf32>
    %215 = vector.extract_strided_slice %212 {offsets = [0, 64], sizes = [2, 32], strides = [1, 1]} : vector<2x96xf32> to vector<2x32xf32>
    %216 = vector.extract_strided_slice %211 {offsets = [0, 0], sizes = [2, 32], strides = [1, 1]} : vector<2x96xf32> to vector<2x32xf32>
    %217 = vector.extract_strided_slice %211 {offsets = [0, 32], sizes = [2, 32], strides = [1, 1]} : vector<2x96xf32> to vector<2x32xf32>
    %218 = vector.extract_strided_slice %211 {offsets = [0, 64], sizes = [2, 32], strides = [1, 1]} : vector<2x96xf32> to vector<2x32xf32>
    %219 = arith.addf %213, %216 : vector<2x32xf32>
    %220 = arith.negf %219 : vector<2x32xf32>
    %221 = math.exp %220 : vector<2x32xf32>
    %cst_42 = arith.constant 1.000000e+00 : f32
    %222 = vector.broadcast %cst_42 : f32 to vector<2x32xf32>
    %223 = arith.addf %222, %221 : vector<2x32xf32>
    %224 = arith.divf %222, %223 : vector<2x32xf32>
    %225 = arith.addf %214, %217 : vector<2x32xf32>
    %226 = arith.negf %225 : vector<2x32xf32>
    %227 = math.exp %226 : vector<2x32xf32>
    %cst_43 = arith.constant 1.000000e+00 : f32
    %228 = vector.broadcast %cst_43 : f32 to vector<2x32xf32>
    %229 = arith.addf %228, %227 : vector<2x32xf32>
    %230 = arith.divf %228, %229 : vector<2x32xf32>
    %231 = arith.mulf %224, %218 : vector<2x32xf32>
    %232 = arith.addf %215, %231 : vector<2x32xf32>
    %233 = math.tanh %232 : vector<2x32xf32>
    %cst_44 = arith.constant 1.000000e+00 : f32
    %234 = vector.broadcast %cst_44 : f32 to vector<2x32xf32>
    %235 = arith.subf %234, %230 : vector<2x32xf32>
    %236 = arith.mulf %235, %233 : vector<2x32xf32>
    %237 = arith.mulf %230, %205 : vector<2x32xf32>
    %238 = arith.addf %236, %237 : vector<2x32xf32>
    %239 = arith.truncf %238 : vector<2x32xf32> to vector<2x32xbf16>
    %c12 = arith.constant 12 : index
    %c0_45 = arith.constant 0 : index
    %240 = vector.load %arg14[%c12, %c0_45] : memref<16x32xbf16, #tpu.memory_space<vmem>>, vector<2x32xbf16>
    tpu.vector_store %arg14[%c12, %c0_45], %239 {strides = array<i32>} : memref<16x32xbf16, #tpu.memory_space<vmem>>, vector<2x32xbf16>,
    %241 = arith.truncf %238 : vector<2x32xf32> to vector<2x32xbf16>
    %cst_46 = arith.constant dense<0.000000e+00> : vector<2x96xf32>
    %242 = tpu.matmul %241, %2, %cst_46 {dimension_numbers = #tpu.dot_dimension_numbers<[1], [0], [0], [1], [0, 0, 1, 1], [], []>} : vector<2x32xbf16>, vector<32x96xbf16>, vector<2x96xf32> -> vector<2x96xf32>
    %243 = vector.broadcast %3 : vector<1x96xf32> to vector<2x96xf32>
    %244 = arith.addf %242, %243 : vector<2x96xf32>
    %245 = vector.extract_strided_slice %8 {offsets = [14, 0], sizes = [2, 96], strides = [1, 1]} : vector<16x96xf32> to vector<2x96xf32>
    %246 = vector.extract_strided_slice %245 {offsets = [0, 0], sizes = [2, 32], strides = [1, 1]} : vector<2x96xf32> to vector<2x32xf32>
    %247 = vector.extract_strided_slice %245 {offsets = [0, 32], sizes = [2, 32], strides = [1, 1]} : vector<2x96xf32> to vector<2x32xf32>
    %248 = vector.extract_strided_slice %245 {offsets = [0, 64], sizes = [2, 32], strides = [1, 1]} : vector<2x96xf32> to vector<2x32xf32>
    %249 = vector.extract_strided_slice %244 {offsets = [0, 0], sizes = [2, 32], strides = [1, 1]} : vector<2x96xf32> to vector<2x32xf32>
    %250 = vector.extract_strided_slice %244 {offsets = [0, 32], sizes = [2, 32], strides = [1, 1]} : vector<2x96xf32> to vector<2x32xf32>
    %251 = vector.extract_strided_slice %244 {offsets = [0, 64], sizes = [2, 32], strides = [1, 1]} : vector<2x96xf32> to vector<2x32xf32>
    %252 = arith.addf %246, %249 : vector<2x32xf32>
    %253 = arith.negf %252 : vector<2x32xf32>
    %254 = math.exp %253 : vector<2x32xf32>
    %cst_47 = arith.constant 1.000000e+00 : f32
    %255 = vector.broadcast %cst_47 : f32 to vector<2x32xf32>
    %256 = arith.addf %255, %254 : vector<2x32xf32>
    %257 = arith.divf %255, %256 : vector<2x32xf32>
    %258 = arith.addf %247, %250 : vector<2x32xf32>
    %259 = arith.negf %258 : vector<2x32xf32>
    %260 = math.exp %259 : vector<2x32xf32>
    %cst_48 = arith.constant 1.000000e+00 : f32
    %261 = vector.broadcast %cst_48 : f32 to vector<2x32xf32>
    %262 = arith.addf %261, %260 : vector<2x32xf32>
    %263 = arith.divf %261, %262 : vector<2x32xf32>
    %264 = arith.mulf %257, %251 : vector<2x32xf32>
    %265 = arith.addf %248, %264 : vector<2x32xf32>
    %266 = math.tanh %265 : vector<2x32xf32>
    %cst_49 = arith.constant 1.000000e+00 : f32
    %267 = vector.broadcast %cst_49 : f32 to vector<2x32xf32>
    %268 = arith.subf %267, %263 : vector<2x32xf32>
    %269 = arith.mulf %268, %266 : vector<2x32xf32>
    %270 = arith.mulf %263, %238 : vector<2x32xf32>
    %271 = arith.addf %269, %270 : vector<2x32xf32>
    %272 = arith.truncf %271 : vector<2x32xf32> to vector<2x32xbf16>
    %c14 = arith.constant 14 : index
    %c0_50 = arith.constant 0 : index
    %273 = vector.load %arg14[%c14, %c0_50] : memref<16x32xbf16, #tpu.memory_space<vmem>>, vector<2x32xbf16>
    tpu.vector_store %arg14[%c14, %c0_50], %272 {strides = array<i32>} : memref<16x32xbf16, #tpu.memory_space<vmem>>, vector<2x32xbf16>,
    %c0_51 = arith.constant 0 : index
    %c0_52 = arith.constant 0 : index
    %274 = vector.load %arg15[%c0_51, %c0_52] : memref<4x32xf32, #tpu.memory_space<vmem>>, vector<2x32xf32>
    tpu.vector_store %arg15[%c0_51, %c0_52], %271 {strides = array<i32>} : memref<4x32xf32, #tpu.memory_space<vmem>>, vector<2x32xf32>,
    %c0_53 = arith.constant 0 : index
    %c0_54 = arith.constant 0 : index
    %275 = vector.load %arg14[%c0_53, %c0_54] : memref<16x32xbf16, #tpu.memory_space<vmem>>, vector<16x32xbf16>
    %c0_55 = arith.constant 0 : index
    %c0_56 = arith.constant 0 : index
    %276 = vector.load %arg6[%c0_55, %c0_56] : memref<32x96xbf16, #tpu.memory_space<vmem>>, vector<32x96xbf16>
    %c0_57 = arith.constant 0 : index
    %c0_58 = arith.constant 0 : index
    %277 = vector.load %arg8[%c0_57, %c0_58] : memref<1x96xf32, #tpu.memory_space<vmem>>, vector<1x96xf32>
    %c0_59 = arith.constant 0 : index
    %c0_60 = arith.constant 0 : index
    %278 = vector.load %arg5[%c0_59, %c0_60] : memref<32x96xbf16, #tpu.memory_space<vmem>>, vector<32x96xbf16>
    %cst_61 = arith.constant dense<0.000000e+00> : vector<16x96xf32>
    %279 = tpu.matmul %275, %278, %cst_61 {dimension_numbers = #tpu.dot_dimension_numbers<[1], [0], [0], [1], [0, 0, 1, 1], [], []>} : vector<16x32xbf16>, vector<32x96xbf16>, vector<16x96xf32> -> vector<16x96xf32>
    %c0_62 = arith.constant 0 : index
    %c0_63 = arith.constant 0 : index
    %280 = vector.load %arg7[%c0_62, %c0_63] : memref<1x96xf32, #tpu.memory_space<vmem>>, vector<1x96xf32>
    %281 = vector.broadcast %280 : vector<1x96xf32> to vector<16x96xf32>
    %282 = arith.addf %279, %281 : vector<16x96xf32>
    %cst_64 = arith.constant 0.000000e+00 : f32
    %283 = vector.broadcast %cst_64 : f32 to vector<2x32xf32>
    %284 = arith.truncf %283 : vector<2x32xf32> to vector<2x32xbf16>
    %cst_65 = arith.constant dense<0.000000e+00> : vector<2x96xf32>
    %285 = tpu.matmul %284, %276, %cst_65 {dimension_numbers = #tpu.dot_dimension_numbers<[1], [0], [0], [1], [0, 0, 1, 1], [], []>} : vector<2x32xbf16>, vector<32x96xbf16>, vector<2x96xf32> -> vector<2x96xf32>
    %286 = vector.broadcast %277 : vector<1x96xf32> to vector<2x96xf32>
    %287 = arith.addf %285, %286 : vector<2x96xf32>
    %288 = vector.extract_strided_slice %282 {offsets = [0, 0], sizes = [2, 96], strides = [1, 1]} : vector<16x96xf32> to vector<2x96xf32>
    %289 = vector.extract_strided_slice %288 {offsets = [0, 0], sizes = [2, 32], strides = [1, 1]} : vector<2x96xf32> to vector<2x32xf32>
    %290 = vector.extract_strided_slice %288 {offsets = [0, 32], sizes = [2, 32], strides = [1, 1]} : vector<2x96xf32> to vector<2x32xf32>
    %291 = vector.extract_strided_slice %288 {offsets = [0, 64], sizes = [2, 32], strides = [1, 1]} : vector<2x96xf32> to vector<2x32xf32>
    %292 = vector.extract_strided_slice %287 {offsets = [0, 0], sizes = [2, 32], strides = [1, 1]} : vector<2x96xf32> to vector<2x32xf32>
    %293 = vector.extract_strided_slice %287 {offsets = [0, 32], sizes = [2, 32], strides = [1, 1]} : vector<2x96xf32> to vector<2x32xf32>
    %294 = vector.extract_strided_slice %287 {offsets = [0, 64], sizes = [2, 32], strides = [1, 1]} : vector<2x96xf32> to vector<2x32xf32>
    %295 = arith.addf %289, %292 : vector<2x32xf32>
    %296 = arith.negf %295 : vector<2x32xf32>
    %297 = math.exp %296 : vector<2x32xf32>
    %cst_66 = arith.constant 1.000000e+00 : f32
    %298 = vector.broadcast %cst_66 : f32 to vector<2x32xf32>
    %299 = arith.addf %298, %297 : vector<2x32xf32>
    %300 = arith.divf %298, %299 : vector<2x32xf32>
    %301 = arith.addf %290, %293 : vector<2x32xf32>
    %302 = arith.negf %301 : vector<2x32xf32>
    %303 = math.exp %302 : vector<2x32xf32>
    %cst_67 = arith.constant 1.000000e+00 : f32
    %304 = vector.broadcast %cst_67 : f32 to vector<2x32xf32>
    %305 = arith.addf %304, %303 : vector<2x32xf32>
    %306 = arith.divf %304, %305 : vector<2x32xf32>
    %307 = arith.mulf %300, %294 : vector<2x32xf32>
    %308 = arith.addf %291, %307 : vector<2x32xf32>
    %309 = math.tanh %308 : vector<2x32xf32>
    %cst_68 = arith.constant 1.000000e+00 : f32
    %310 = vector.broadcast %cst_68 : f32 to vector<2x32xf32>
    %311 = arith.subf %310, %306 : vector<2x32xf32>
    %312 = arith.mulf %311, %309 : vector<2x32xf32>
    %313 = arith.mulf %306, %283 : vector<2x32xf32>
    %314 = arith.addf %312, %313 : vector<2x32xf32>
    %315 = arith.truncf %314 : vector<2x32xf32> to vector<2x32xbf16>
    %cst_69 = arith.constant dense<0.000000e+00> : vector<2x96xf32>
    %316 = tpu.matmul %315, %276, %cst_69 {dimension_numbers = #tpu.dot_dimension_numbers<[1], [0], [0], [1], [0, 0, 1, 1], [], []>} : vector<2x32xbf16>, vector<32x96xbf16>, vector<2x96xf32> -> vector<2x96xf32>
    %317 = vector.broadcast %277 : vector<1x96xf32> to vector<2x96xf32>
    %318 = arith.addf %316, %317 : vector<2x96xf32>
    %319 = vector.extract_strided_slice %282 {offsets = [2, 0], sizes = [2, 96], strides = [1, 1]} : vector<16x96xf32> to vector<2x96xf32>
    %320 = vector.extract_strided_slice %319 {offsets = [0, 0], sizes = [2, 32], strides = [1, 1]} : vector<2x96xf32> to vector<2x32xf32>
    %321 = vector.extract_strided_slice %319 {offsets = [0, 32], sizes = [2, 32], strides = [1, 1]} : vector<2x96xf32> to vector<2x32xf32>
    %322 = vector.extract_strided_slice %319 {offsets = [0, 64], sizes = [2, 32], strides = [1, 1]} : vector<2x96xf32> to vector<2x32xf32>
    %323 = vector.extract_strided_slice %318 {offsets = [0, 0], sizes = [2, 32], strides = [1, 1]} : vector<2x96xf32> to vector<2x32xf32>
    %324 = vector.extract_strided_slice %318 {offsets = [0, 32], sizes = [2, 32], strides = [1, 1]} : vector<2x96xf32> to vector<2x32xf32>
    %325 = vector.extract_strided_slice %318 {offsets = [0, 64], sizes = [2, 32], strides = [1, 1]} : vector<2x96xf32> to vector<2x32xf32>
    %326 = arith.addf %320, %323 : vector<2x32xf32>
    %327 = arith.negf %326 : vector<2x32xf32>
    %328 = math.exp %327 : vector<2x32xf32>
    %cst_70 = arith.constant 1.000000e+00 : f32
    %329 = vector.broadcast %cst_70 : f32 to vector<2x32xf32>
    %330 = arith.addf %329, %328 : vector<2x32xf32>
    %331 = arith.divf %329, %330 : vector<2x32xf32>
    %332 = arith.addf %321, %324 : vector<2x32xf32>
    %333 = arith.negf %332 : vector<2x32xf32>
    %334 = math.exp %333 : vector<2x32xf32>
    %cst_71 = arith.constant 1.000000e+00 : f32
    %335 = vector.broadcast %cst_71 : f32 to vector<2x32xf32>
    %336 = arith.addf %335, %334 : vector<2x32xf32>
    %337 = arith.divf %335, %336 : vector<2x32xf32>
    %338 = arith.mulf %331, %325 : vector<2x32xf32>
    %339 = arith.addf %322, %338 : vector<2x32xf32>
    %340 = math.tanh %339 : vector<2x32xf32>
    %cst_72 = arith.constant 1.000000e+00 : f32
    %341 = vector.broadcast %cst_72 : f32 to vector<2x32xf32>
    %342 = arith.subf %341, %337 : vector<2x32xf32>
    %343 = arith.mulf %342, %340 : vector<2x32xf32>
    %344 = arith.mulf %337, %314 : vector<2x32xf32>
    %345 = arith.addf %343, %344 : vector<2x32xf32>
    %346 = arith.truncf %345 : vector<2x32xf32> to vector<2x32xbf16>
    %cst_73 = arith.constant dense<0.000000e+00> : vector<2x96xf32>
    %347 = tpu.matmul %346, %276, %cst_73 {dimension_numbers = #tpu.dot_dimension_numbers<[1], [0], [0], [1], [0, 0, 1, 1], [], []>} : vector<2x32xbf16>, vector<32x96xbf16>, vector<2x96xf32> -> vector<2x96xf32>
    %348 = vector.broadcast %277 : vector<1x96xf32> to vector<2x96xf32>
    %349 = arith.addf %347, %348 : vector<2x96xf32>
    %350 = vector.extract_strided_slice %282 {offsets = [4, 0], sizes = [2, 96], strides = [1, 1]} : vector<16x96xf32> to vector<2x96xf32>
    %351 = vector.extract_strided_slice %350 {offsets = [0, 0], sizes = [2, 32], strides = [1, 1]} : vector<2x96xf32> to vector<2x32xf32>
    %352 = vector.extract_strided_slice %350 {offsets = [0, 32], sizes = [2, 32], strides = [1, 1]} : vector<2x96xf32> to vector<2x32xf32>
    %353 = vector.extract_strided_slice %350 {offsets = [0, 64], sizes = [2, 32], strides = [1, 1]} : vector<2x96xf32> to vector<2x32xf32>
    %354 = vector.extract_strided_slice %349 {offsets = [0, 0], sizes = [2, 32], strides = [1, 1]} : vector<2x96xf32> to vector<2x32xf32>
    %355 = vector.extract_strided_slice %349 {offsets = [0, 32], sizes = [2, 32], strides = [1, 1]} : vector<2x96xf32> to vector<2x32xf32>
    %356 = vector.extract_strided_slice %349 {offsets = [0, 64], sizes = [2, 32], strides = [1, 1]} : vector<2x96xf32> to vector<2x32xf32>
    %357 = arith.addf %351, %354 : vector<2x32xf32>
    %358 = arith.negf %357 : vector<2x32xf32>
    %359 = math.exp %358 : vector<2x32xf32>
    %cst_74 = arith.constant 1.000000e+00 : f32
    %360 = vector.broadcast %cst_74 : f32 to vector<2x32xf32>
    %361 = arith.addf %360, %359 : vector<2x32xf32>
    %362 = arith.divf %360, %361 : vector<2x32xf32>
    %363 = arith.addf %352, %355 : vector<2x32xf32>
    %364 = arith.negf %363 : vector<2x32xf32>
    %365 = math.exp %364 : vector<2x32xf32>
    %cst_75 = arith.constant 1.000000e+00 : f32
    %366 = vector.broadcast %cst_75 : f32 to vector<2x32xf32>
    %367 = arith.addf %366, %365 : vector<2x32xf32>
    %368 = arith.divf %366, %367 : vector<2x32xf32>
    %369 = arith.mulf %362, %356 : vector<2x32xf32>
    %370 = arith.addf %353, %369 : vector<2x32xf32>
    %371 = math.tanh %370 : vector<2x32xf32>
    %cst_76 = arith.constant 1.000000e+00 : f32
    %372 = vector.broadcast %cst_76 : f32 to vector<2x32xf32>
    %373 = arith.subf %372, %368 : vector<2x32xf32>
    %374 = arith.mulf %373, %371 : vector<2x32xf32>
    %375 = arith.mulf %368, %345 : vector<2x32xf32>
    %376 = arith.addf %374, %375 : vector<2x32xf32>
    %377 = arith.truncf %376 : vector<2x32xf32> to vector<2x32xbf16>
    %cst_77 = arith.constant dense<0.000000e+00> : vector<2x96xf32>
    %378 = tpu.matmul %377, %276, %cst_77 {dimension_numbers = #tpu.dot_dimension_numbers<[1], [0], [0], [1], [0, 0, 1, 1], [], []>} : vector<2x32xbf16>, vector<32x96xbf16>, vector<2x96xf32> -> vector<2x96xf32>
    %379 = vector.broadcast %277 : vector<1x96xf32> to vector<2x96xf32>
    %380 = arith.addf %378, %379 : vector<2x96xf32>
    %381 = vector.extract_strided_slice %282 {offsets = [6, 0], sizes = [2, 96], strides = [1, 1]} : vector<16x96xf32> to vector<2x96xf32>
    %382 = vector.extract_strided_slice %381 {offsets = [0, 0], sizes = [2, 32], strides = [1, 1]} : vector<2x96xf32> to vector<2x32xf32>
    %383 = vector.extract_strided_slice %381 {offsets = [0, 32], sizes = [2, 32], strides = [1, 1]} : vector<2x96xf32> to vector<2x32xf32>
    %384 = vector.extract_strided_slice %381 {offsets = [0, 64], sizes = [2, 32], strides = [1, 1]} : vector<2x96xf32> to vector<2x32xf32>
    %385 = vector.extract_strided_slice %380 {offsets = [0, 0], sizes = [2, 32], strides = [1, 1]} : vector<2x96xf32> to vector<2x32xf32>
    %386 = vector.extract_strided_slice %380 {offsets = [0, 32], sizes = [2, 32], strides = [1, 1]} : vector<2x96xf32> to vector<2x32xf32>
    %387 = vector.extract_strided_slice %380 {offsets = [0, 64], sizes = [2, 32], strides = [1, 1]} : vector<2x96xf32> to vector<2x32xf32>
    %388 = arith.addf %382, %385 : vector<2x32xf32>
    %389 = arith.negf %388 : vector<2x32xf32>
    %390 = math.exp %389 : vector<2x32xf32>
    %cst_78 = arith.constant 1.000000e+00 : f32
    %391 = vector.broadcast %cst_78 : f32 to vector<2x32xf32>
    %392 = arith.addf %391, %390 : vector<2x32xf32>
    %393 = arith.divf %391, %392 : vector<2x32xf32>
    %394 = arith.addf %383, %386 : vector<2x32xf32>
    %395 = arith.negf %394 : vector<2x32xf32>
    %396 = math.exp %395 : vector<2x32xf32>
    %cst_79 = arith.constant 1.000000e+00 : f32
    %397 = vector.broadcast %cst_79 : f32 to vector<2x32xf32>
    %398 = arith.addf %397, %396 : vector<2x32xf32>
    %399 = arith.divf %397, %398 : vector<2x32xf32>
    %400 = arith.mulf %393, %387 : vector<2x32xf32>
    %401 = arith.addf %384, %400 : vector<2x32xf32>
    %402 = math.tanh %401 : vector<2x32xf32>
    %cst_80 = arith.constant 1.000000e+00 : f32
    %403 = vector.broadcast %cst_80 : f32 to vector<2x32xf32>
    %404 = arith.subf %403, %399 : vector<2x32xf32>
    %405 = arith.mulf %404, %402 : vector<2x32xf32>
    %406 = arith.mulf %399, %376 : vector<2x32xf32>
    %407 = arith.addf %405, %406 : vector<2x32xf32>
    %408 = arith.truncf %407 : vector<2x32xf32> to vector<2x32xbf16>
    %cst_81 = arith.constant dense<0.000000e+00> : vector<2x96xf32>
    %409 = tpu.matmul %408, %276, %cst_81 {dimension_numbers = #tpu.dot_dimension_numbers<[1], [0], [0], [1], [0, 0, 1, 1], [], []>} : vector<2x32xbf16>, vector<32x96xbf16>, vector<2x96xf32> -> vector<2x96xf32>
    %410 = vector.broadcast %277 : vector<1x96xf32> to vector<2x96xf32>
    %411 = arith.addf %409, %410 : vector<2x96xf32>
    %412 = vector.extract_strided_slice %282 {offsets = [8, 0], sizes = [2, 96], strides = [1, 1]} : vector<16x96xf32> to vector<2x96xf32>
    %413 = vector.extract_strided_slice %412 {offsets = [0, 0], sizes = [2, 32], strides = [1, 1]} : vector<2x96xf32> to vector<2x32xf32>
    %414 = vector.extract_strided_slice %412 {offsets = [0, 32], sizes = [2, 32], strides = [1, 1]} : vector<2x96xf32> to vector<2x32xf32>
    %415 = vector.extract_strided_slice %412 {offsets = [0, 64], sizes = [2, 32], strides = [1, 1]} : vector<2x96xf32> to vector<2x32xf32>
    %416 = vector.extract_strided_slice %411 {offsets = [0, 0], sizes = [2, 32], strides = [1, 1]} : vector<2x96xf32> to vector<2x32xf32>
    %417 = vector.extract_strided_slice %411 {offsets = [0, 32], sizes = [2, 32], strides = [1, 1]} : vector<2x96xf32> to vector<2x32xf32>
    %418 = vector.extract_strided_slice %411 {offsets = [0, 64], sizes = [2, 32], strides = [1, 1]} : vector<2x96xf32> to vector<2x32xf32>
    %419 = arith.addf %413, %416 : vector<2x32xf32>
    %420 = arith.negf %419 : vector<2x32xf32>
    %421 = math.exp %420 : vector<2x32xf32>
    %cst_82 = arith.constant 1.000000e+00 : f32
    %422 = vector.broadcast %cst_82 : f32 to vector<2x32xf32>
    %423 = arith.addf %422, %421 : vector<2x32xf32>
    %424 = arith.divf %422, %423 : vector<2x32xf32>
    %425 = arith.addf %414, %417 : vector<2x32xf32>
    %426 = arith.negf %425 : vector<2x32xf32>
    %427 = math.exp %426 : vector<2x32xf32>
    %cst_83 = arith.constant 1.000000e+00 : f32
    %428 = vector.broadcast %cst_83 : f32 to vector<2x32xf32>
    %429 = arith.addf %428, %427 : vector<2x32xf32>
    %430 = arith.divf %428, %429 : vector<2x32xf32>
    %431 = arith.mulf %424, %418 : vector<2x32xf32>
    %432 = arith.addf %415, %431 : vector<2x32xf32>
    %433 = math.tanh %432 : vector<2x32xf32>
    %cst_84 = arith.constant 1.000000e+00 : f32
    %434 = vector.broadcast %cst_84 : f32 to vector<2x32xf32>
    %435 = arith.subf %434, %430 : vector<2x32xf32>
    %436 = arith.mulf %435, %433 : vector<2x32xf32>
    %437 = arith.mulf %430, %407 : vector<2x32xf32>
    %438 = arith.addf %436, %437 : vector<2x32xf32>
    %439 = arith.truncf %438 : vector<2x32xf32> to vector<2x32xbf16>
    %cst_85 = arith.constant dense<0.000000e+00> : vector<2x96xf32>
    %440 = tpu.matmul %439, %276, %cst_85 {dimension_numbers = #tpu.dot_dimension_numbers<[1], [0], [0], [1], [0, 0, 1, 1], [], []>} : vector<2x32xbf16>, vector<32x96xbf16>, vector<2x96xf32> -> vector<2x96xf32>
    %441 = vector.broadcast %277 : vector<1x96xf32> to vector<2x96xf32>
    %442 = arith.addf %440, %441 : vector<2x96xf32>
    %443 = vector.extract_strided_slice %282 {offsets = [10, 0], sizes = [2, 96], strides = [1, 1]} : vector<16x96xf32> to vector<2x96xf32>
    %444 = vector.extract_strided_slice %443 {offsets = [0, 0], sizes = [2, 32], strides = [1, 1]} : vector<2x96xf32> to vector<2x32xf32>
    %445 = vector.extract_strided_slice %443 {offsets = [0, 32], sizes = [2, 32], strides = [1, 1]} : vector<2x96xf32> to vector<2x32xf32>
    %446 = vector.extract_strided_slice %443 {offsets = [0, 64], sizes = [2, 32], strides = [1, 1]} : vector<2x96xf32> to vector<2x32xf32>
    %447 = vector.extract_strided_slice %442 {offsets = [0, 0], sizes = [2, 32], strides = [1, 1]} : vector<2x96xf32> to vector<2x32xf32>
    %448 = vector.extract_strided_slice %442 {offsets = [0, 32], sizes = [2, 32], strides = [1, 1]} : vector<2x96xf32> to vector<2x32xf32>
    %449 = vector.extract_strided_slice %442 {offsets = [0, 64], sizes = [2, 32], strides = [1, 1]} : vector<2x96xf32> to vector<2x32xf32>
    %450 = arith.addf %444, %447 : vector<2x32xf32>
    %451 = arith.negf %450 : vector<2x32xf32>
    %452 = math.exp %451 : vector<2x32xf32>
    %cst_86 = arith.constant 1.000000e+00 : f32
    %453 = vector.broadcast %cst_86 : f32 to vector<2x32xf32>
    %454 = arith.addf %453, %452 : vector<2x32xf32>
    %455 = arith.divf %453, %454 : vector<2x32xf32>
    %456 = arith.addf %445, %448 : vector<2x32xf32>
    %457 = arith.negf %456 : vector<2x32xf32>
    %458 = math.exp %457 : vector<2x32xf32>
    %cst_87 = arith.constant 1.000000e+00 : f32
    %459 = vector.broadcast %cst_87 : f32 to vector<2x32xf32>
    %460 = arith.addf %459, %458 : vector<2x32xf32>
    %461 = arith.divf %459, %460 : vector<2x32xf32>
    %462 = arith.mulf %455, %449 : vector<2x32xf32>
    %463 = arith.addf %446, %462 : vector<2x32xf32>
    %464 = math.tanh %463 : vector<2x32xf32>
    %cst_88 = arith.constant 1.000000e+00 : f32
    %465 = vector.broadcast %cst_88 : f32 to vector<2x32xf32>
    %466 = arith.subf %465, %461 : vector<2x32xf32>
    %467 = arith.mulf %466, %464 : vector<2x32xf32>
    %468 = arith.mulf %461, %438 : vector<2x32xf32>
    %469 = arith.addf %467, %468 : vector<2x32xf32>
    %470 = arith.truncf %469 : vector<2x32xf32> to vector<2x32xbf16>
    %cst_89 = arith.constant dense<0.000000e+00> : vector<2x96xf32>
    %471 = tpu.matmul %470, %276, %cst_89 {dimension_numbers = #tpu.dot_dimension_numbers<[1], [0], [0], [1], [0, 0, 1, 1], [], []>} : vector<2x32xbf16>, vector<32x96xbf16>, vector<2x96xf32> -> vector<2x96xf32>
    %472 = vector.broadcast %277 : vector<1x96xf32> to vector<2x96xf32>
    %473 = arith.addf %471, %472 : vector<2x96xf32>
    %474 = vector.extract_strided_slice %282 {offsets = [12, 0], sizes = [2, 96], strides = [1, 1]} : vector<16x96xf32> to vector<2x96xf32>
    %475 = vector.extract_strided_slice %474 {offsets = [0, 0], sizes = [2, 32], strides = [1, 1]} : vector<2x96xf32> to vector<2x32xf32>
    %476 = vector.extract_strided_slice %474 {offsets = [0, 32], sizes = [2, 32], strides = [1, 1]} : vector<2x96xf32> to vector<2x32xf32>
    %477 = vector.extract_strided_slice %474 {offsets = [0, 64], sizes = [2, 32], strides = [1, 1]} : vector<2x96xf32> to vector<2x32xf32>
    %478 = vector.extract_strided_slice %473 {offsets = [0, 0], sizes = [2, 32], strides = [1, 1]} : vector<2x96xf32> to vector<2x32xf32>
    %479 = vector.extract_strided_slice %473 {offsets = [0, 32], sizes = [2, 32], strides = [1, 1]} : vector<2x96xf32> to vector<2x32xf32>
    %480 = vector.extract_strided_slice %473 {offsets = [0, 64], sizes = [2, 32], strides = [1, 1]} : vector<2x96xf32> to vector<2x32xf32>
    %481 = arith.addf %475, %478 : vector<2x32xf32>
    %482 = arith.negf %481 : vector<2x32xf32>
    %483 = math.exp %482 : vector<2x32xf32>
    %cst_90 = arith.constant 1.000000e+00 : f32
    %484 = vector.broadcast %cst_90 : f32 to vector<2x32xf32>
    %485 = arith.addf %484, %483 : vector<2x32xf32>
    %486 = arith.divf %484, %485 : vector<2x32xf32>
    %487 = arith.addf %476, %479 : vector<2x32xf32>
    %488 = arith.negf %487 : vector<2x32xf32>
    %489 = math.exp %488 : vector<2x32xf32>
    %cst_91 = arith.constant 1.000000e+00 : f32
    %490 = vector.broadcast %cst_91 : f32 to vector<2x32xf32>
    %491 = arith.addf %490, %489 : vector<2x32xf32>
    %492 = arith.divf %490, %491 : vector<2x32xf32>
    %493 = arith.mulf %486, %480 : vector<2x32xf32>
    %494 = arith.addf %477, %493 : vector<2x32xf32>
    %495 = math.tanh %494 : vector<2x32xf32>
    %cst_92 = arith.constant 1.000000e+00 : f32
    %496 = vector.broadcast %cst_92 : f32 to vector<2x32xf32>
    %497 = arith.subf %496, %492 : vector<2x32xf32>
    %498 = arith.mulf %497, %495 : vector<2x32xf32>
    %499 = arith.mulf %492, %469 : vector<2x32xf32>
    %500 = arith.addf %498, %499 : vector<2x32xf32>
    %501 = arith.truncf %500 : vector<2x32xf32> to vector<2x32xbf16>
    %cst_93 = arith.constant dense<0.000000e+00> : vector<2x96xf32>
    %502 = tpu.matmul %501, %276, %cst_93 {dimension_numbers = #tpu.dot_dimension_numbers<[1], [0], [0], [1], [0, 0, 1, 1], [], []>} : vector<2x32xbf16>, vector<32x96xbf16>, vector<2x96xf32> -> vector<2x96xf32>
    %503 = vector.broadcast %277 : vector<1x96xf32> to vector<2x96xf32>
    %504 = arith.addf %502, %503 : vector<2x96xf32>
    %505 = vector.extract_strided_slice %282 {offsets = [14, 0], sizes = [2, 96], strides = [1, 1]} : vector<16x96xf32> to vector<2x96xf32>
    %506 = vector.extract_strided_slice %505 {offsets = [0, 0], sizes = [2, 32], strides = [1, 1]} : vector<2x96xf32> to vector<2x32xf32>
    %507 = vector.extract_strided_slice %505 {offsets = [0, 32], sizes = [2, 32], strides = [1, 1]} : vector<2x96xf32> to vector<2x32xf32>
    %508 = vector.extract_strided_slice %505 {offsets = [0, 64], sizes = [2, 32], strides = [1, 1]} : vector<2x96xf32> to vector<2x32xf32>
    %509 = vector.extract_strided_slice %504 {offsets = [0, 0], sizes = [2, 32], strides = [1, 1]} : vector<2x96xf32> to vector<2x32xf32>
    %510 = vector.extract_strided_slice %504 {offsets = [0, 32], sizes = [2, 32], strides = [1, 1]} : vector<2x96xf32> to vector<2x32xf32>
    %511 = vector.extract_strided_slice %504 {offsets = [0, 64], sizes = [2, 32], strides = [1, 1]} : vector<2x96xf32> to vector<2x32xf32>
    %512 = arith.addf %506, %509 : vector<2x32xf32>
    %513 = arith.negf %512 : vector<2x32xf32>
    %514 = math.exp %513 : vector<2x32xf32>
    %cst_94 = arith.constant 1.000000e+00 : f32
    %515 = vector.broadcast %cst_94 : f32 to vector<2x32xf32>
    %516 = arith.addf %515, %514 : vector<2x32xf32>
    %517 = arith.divf %515, %516 : vector<2x32xf32>
    %518 = arith.addf %507, %510 : vector<2x32xf32>
    %519 = arith.negf %518 : vector<2x32xf32>
    %520 = math.exp %519 : vector<2x32xf32>
    %cst_95 = arith.constant 1.000000e+00 : f32
    %521 = vector.broadcast %cst_95 : f32 to vector<2x32xf32>
    %522 = arith.addf %521, %520 : vector<2x32xf32>
    %523 = arith.divf %521, %522 : vector<2x32xf32>
    %524 = arith.mulf %517, %511 : vector<2x32xf32>
    %525 = arith.addf %508, %524 : vector<2x32xf32>
    %526 = math.tanh %525 : vector<2x32xf32>
    %cst_96 = arith.constant 1.000000e+00 : f32
    %527 = vector.broadcast %cst_96 : f32 to vector<2x32xf32>
    %528 = arith.subf %527, %523 : vector<2x32xf32>
    %529 = arith.mulf %528, %526 : vector<2x32xf32>
    %530 = arith.mulf %523, %500 : vector<2x32xf32>
    %531 = arith.addf %529, %530 : vector<2x32xf32>
    %c2_97 = arith.constant 2 : index
    %c0_98 = arith.constant 0 : index
    %532 = vector.load %arg15[%c2_97, %c0_98] : memref<4x32xf32, #tpu.memory_space<vmem>>, vector<2x32xf32>
    tpu.vector_store %arg15[%c2_97, %c0_98], %531 {strides = array<i32>} : memref<4x32xf32, #tpu.memory_space<vmem>>, vector<2x32xf32>,
    %c0_99 = arith.constant 0 : index
    %c0_100 = arith.constant 0 : index
    %533 = vector.load %arg15[%c0_99, %c0_100] : memref<4x32xf32, #tpu.memory_space<vmem>>, vector<4x32xf32>
    %cst_101 = arith.constant 0.000000e+00 : f32
    %534 = vector.broadcast %cst_101 : f32 to vector<4x32xf32>
    %535 = arith.maximumf %533, %534 : vector<4x32xf32>
    %536 = arith.truncf %535 : vector<4x32xf32> to vector<4x32xbf16>
    %c0_102 = arith.constant 0 : index
    %c0_103 = arith.constant 0 : index
    %537 = vector.load %arg9[%c0_102, %c0_103] : memref<32x2048xbf16, #tpu.memory_space<vmem>>, vector<32x2048xbf16>
    %cst_104 = arith.constant dense<0.000000e+00> : vector<4x2048xf32>
    %538 = tpu.matmul %536, %537, %cst_104 {dimension_numbers = #tpu.dot_dimension_numbers<[1], [0], [0], [1], [0, 0, 1, 1], [], []>} : vector<4x32xbf16>, vector<32x2048xbf16>, vector<4x2048xf32> -> vector<4x2048xf32>
    %c0_105 = arith.constant 0 : index
    %c0_106 = arith.constant 0 : index
    %539 = vector.load %arg10[%c0_105, %c0_106] : memref<1x2048xf32, #tpu.memory_space<vmem>>, vector<1x2048xf32>
    %540 = vector.broadcast %539 : vector<1x2048xf32> to vector<4x2048xf32>
    %541 = arith.addf %538, %540 : vector<4x2048xf32>
    %cst_107 = arith.constant 0.000000e+00 : f32
    %542 = vector.broadcast %cst_107 : f32 to vector<4x2048xf32>
    %543 = arith.maximumf %541, %542 : vector<4x2048xf32>
    %544 = arith.truncf %543 : vector<4x2048xf32> to vector<4x2048xbf16>
    %c0_108 = arith.constant 0 : index
    %c0_109 = arith.constant 0 : index
    %545 = vector.load %arg11[%c0_108, %c0_109] : memref<2048x32xbf16, #tpu.memory_space<vmem>>, vector<2048x32xbf16>
    %cst_110 = arith.constant dense<0.000000e+00> : vector<4x32xf32>
    %546 = tpu.matmul %544, %545, %cst_110 {dimension_numbers = #tpu.dot_dimension_numbers<[1], [0], [0], [1], [0, 0, 1, 1], [], []>} : vector<4x2048xbf16>, vector<2048x32xbf16>, vector<4x32xf32> -> vector<4x32xf32>
    %c0_111 = arith.constant 0 : index
    %c0_112 = arith.constant 0 : index
    %547 = vector.load %arg12[%c0_111, %c0_112] : memref<1x32xf32, #tpu.memory_space<vmem>>, vector<1x32xf32>
    %548 = vector.broadcast %547 : vector<1x32xf32> to vector<4x32xf32>
    %549 = arith.addf %546, %548 : vector<4x32xf32>
    %c0_113 = arith.constant 0 : index
    %c0_114 = arith.constant 0 : index
    %550 = vector.load %arg13[%c0_113, %c0_114] : memref<4x32xf32, #tpu.memory_space<vmem>>, vector<4x32xf32>
    tpu.vector_store %arg13[%c0_113, %c0_114], %549 {strides = array<i32>} : memref<4x32xf32, #tpu.memory_space<vmem>>, vector<4x32xf32>,
    return
  }
}

</mosaic_0001>

<bundles_post_ra>
// kernel: _forward_jit.1
= control target key start
LH: loop header
LB: loop body
LE: loop exit
PB: predicated region body
PF: predicated region fallthrough
CT: control target
= control target key end

     0   :  { %v4360_v1 = vmov 0.0   ;;  %vm66_vm0 = vcmask 1043456   ;;  %vm62_vm1 = vcmask 64512   ;;  %vm4361_vm2 = vmmov 0   ;;  %s5366_s0 = inlined_call_operand.vmem [shape: f32[16,8], index: 0, kind: input, shape index: {}]   ;;  %s5367_s1 = inlined_call_operand.vmem [shape: bf16[8,96], index: 1, kind: input, shape index: {}]   ;;  %s5368_s2 = inlined_call_operand.vmem [shape: bf16[32,96], index: 2, kind: input, shape index: {}]   ;;  %s5369_s3 = inlined_call_operand.vmem [shape: f32[1,96], index: 3, kind: input, shape index: {}]   ;;  %s5370_s4 = inlined_call_operand.vmem [shape: f32[1,96], index: 4, kind: input, shape index: {}]   ;;  %s5371_s5 = inlined_call_operand.vmem [shape: bf16[32,96], index: 5, kind: input, shape index: {}]   ;;  %s5372_s6 = inlined_call_operand.vmem [shape: bf16[32,96], index: 6, kind: input, shape index: {}]   ;;  %s5373_s7 = inlined_call_operand.vmem [shape: f32[1,96], index: 7, kind: input, shape index: {}]   ;;  %s5374_s8 = inlined_call_operand.vmem [shape: f32[1,96], index: 8, kind: input, shape index: {}]   ;;  %s5375_s9 = inlined_call_operand.vmem [shape: bf16[32,2048], index: 9, kind: input, shape index: {}]   ;;  %s5376_s10 = inlined_call_operand.vmem [shape: f32[1,2048], index: 10, kind: input, shape index: {}]   ;;  %s5377_s11 = inlined_call_operand.vmem [shape: bf16[2048,32], index: 11, kind: input, shape index: {}]   ;;  %s5378_s12 = inlined_call_operand.vmem [shape: f32[1,32], index: 12, kind: input, shape index: {}]   ;;  %s5379_s13 = inlined_call_operand.hbm [shape: f32[4,32], index: 13, kind: output, shape index: {}]  }
   0x1   :  { %v4439_v0 = vld [vmem:[%s5368_s2] sm:$0xff]   ;;  %3964 = vmatprep.subr.bf16.mxu1 %v4360_v1  ;;  %3958 = vmatprep.subr.bf16.mxu0 %v4360_v1  ;;  %v4449_v3 = vld [vmem:[%s5368_s2 + $0x8] sm:$0xff]   ;;  %v4362_v8 = vmov 0  }
   0x2   :  { %v54_v2 = vld [vmem:[%s5367_s1] sm:$0xf]  ;;  %3965 = vmatpush3.bf16.msra.mxu1 %v4439_v0  ;;  %v47_v6 = vld [vmem:[%s5366_s0 + $0x8] sm:$0xff]  ;;  %3960 = vmatprep.mubr.msk.bf16.mxu0 %vm4361_vm2, %v4360_v1 }
   0x3   :  { %v68_v4 = vsel %vm66_vm0, %v54_v2, 0  ;;  %v46_v5 = vld [vmem:[%s5366_s0] sm:$0xff]  ;;  %3966 = vmatprep.subr.bf16.mxu1 %v4360_v1  ;;  %3968 = vmatprep.mubr.msk.bf16.mxu1 %vm4361_vm2, %v4360_v1 }
   0x4   :  { %3959 = vmatpush3.bf16.msra.mxu0 %v68_v4  ;;  %v48_v7 = vpack.c.bf16 %v47_v6, %v46_v5 }
   0x5   :  { %3972 = vmatprep.subr.bf16.mxu0 %v4360_v1 }
   0x6   :  { %3967 = vmatpush3.bf16.msra.mxu1 %v4449_v3 }
   0x7   :  { %3961 = vmatmul.mubr.msk.bf16.vlgmr.msra.gmra.mrb[0].mxu0 %vm62_vm1, %v48_v7  ;;  %3980 = vmatprep.subr.bf16.mxu1 %v4360_v1 }
   0x8   :  { %3973 = vmatpush3.bf16.msra.mxu0 %v4439_v0  ;;  %3976 = vmatprep.mubr.msk.bf16.mxu0 %vm4361_vm2, %v4360_v1 }
   0x9   :  { %3974 = vmatprep.subr.bf16.mxu0 %v4360_v1  ;;  %3969 = vmatmul.mubr.bf16.vlgmr.msra.gmra.mrb[0].mxu1 %v4362_v8 }
   0xa   :  { %3981 = vmatpush3.bf16.msra.mxu1 %v4439_v0  ;;  %3984 = vmatprep.mubr.msk.bf16.mxu1 %vm4361_vm2, %v4360_v1 }
   0xb   :  { %3982 = vmatprep.subr.bf16.mxu1 %v4360_v1 }
   0xc   :  { %3975 = vmatpush3.bf16.msra.mxu0 %v4449_v3 }
   0xd   :  { %3988 = vmatprep.subr.bf16.mxu0 %v4360_v1 }
   0xe   :  { %3983 = vmatpush3.bf16.msra.mxu1 %v4449_v3 }
   0xf   :  { %3996 = vmatprep.subr.bf16.mxu1 %v4360_v1 }
  0x10   :  { %18 = vsyncpa [#allocation5], 0  ;;  %v4482_v10 = vld [vmem:[%s5370_s4] ss:$0 sm:$0xff]  ;;  %s4363_s19 = smov 64   ;;  %vm204_vm3 = vcmask 253952  }
  0x11   :  { %v3518_v12 = vld [vmem:[%s5369_s3] ss:$0 sm:$0xff]  ;;  %s4364_s3 = smov 96   ;;  %vm129_vm4 = vcmask 261120   ;;  %vm285_vm5 = vcmask 254977   ;;  %vm453_vm6 = vcmask 257027  }
  0x12   :  { %vm620_vm7 = vcmask 259077   ;;  %vm369_vm8 = vcmask 256002   ;;  %vm536_vm9 = vcmask 258052   ;;  %vm705_vm10 = vcmask 260102  }
  0x13   :  { %vm790_vm11 = vcmask 261127   ;;  %vm796_vm12 = vcmask 261126   ;;  %vm3502_vm13 = vcmask 257024  }
  0xda   :  { %v104_v9 = vpop.f32.mrb[0].mxu0 }
  0xdb   :  { %v3962_v11 = vpop.f32.mrb[1].mxu0  ;;  %v4491_v21 = vadd.f32 %v3518_v12, %v104_v9 }
  0xdc   :  { %v107_v13 = vpop.f32.mrb[2].mxu0  ;;  %v167_v14 = vpop.f32.mrb[0].mxu1 }
  0xdd   :  { %v4487_v15 = vadd.f32 %v3518_v12, %v107_v13  ;;  %v3963_v16 = vpop.f32.mrb[3].mxu0  ;;  %v168_v17 = vadd.f32 %v4482_v10, %v167_v14  ;;  %v3970_v18 = vpop.f32.mrb[1].mxu1 }
  0xde   :  { %v170_v19 = vpop.f32.mrb[2].mxu1 }
  0xdf   :  { %181 = vrot.lane.b32.xlu0 %v168_v17, %s4363_s19  ;;  %v3971_v20 = vpop.f32.mrb[3].mxu1  ;;  %v173_v22 = vadd.f32 %v168_v17, %v4491_v21 }
  0xe1   :  { %v3523_v23 = vmul.f32 -1.442695, %v173_v22 }
  0xe3   :  { %4240 = vpow2.f32 %v3523_v23 }
  0xed   :  { %v4241_v24 = vpop.eup %4240 }
  0xee   :  { %v177_v25 = vadd.f32 1.0, %v4241_v24 }
  0xf0   :  { %4242 = vrcp.f32 %v177_v25 }
  0xfa   :  { %v4243_v26 = vpop.eup %4242 }
  0xfb   :  { %v191_v32 = vsub.f32 1.0, %v4243_v26  ;;  %v197_v34 = vmul.f32 0.0, %v4243_v26 }
 0x151   :  { %v182_v27 = vpop.permute.xlu0 %181 }
 0x152   :  { %v184_v28 = vmul.f32 %v4243_v26, %v182_v27 }
 0x154   :  { %186 = vrot.lane.b32.xlu0 %v184_v28, %s4363_s19 }
 0x1c6   :  { %v187_v29 = vpop.permute.xlu0 %186 }
 0x1c7   :  { %v189_v30 = vadd.f32 %v187_v29, %v4491_v21 }
 0x1c9   :  { %4244 = vtanh.f32 %v189_v30 }
 0x1d3   :  { %v4245_v31 = vpop.eup %4244 }
 0x1d4   :  { %193 = vrot.lane.b32.xlu1 %v4245_v31, %s4364_s3 }
 0x246   :  { %v194_v33 = vpop.permute.xlu1 %193 }
 0x247   :  { %v196_v35 = vmul.f32 %v194_v33, %v191_v32 }
 0x249   :  { %v198_v36 = vadd.f32 %v197_v34, %v196_v35 }
 0x24b   :  { %v199_v37 = vpack.c.bf16 %v198_v36, %v198_v36  ;;  %v276_v55 = vrot.slane %v198_v36, 6 }
 0x24d   :  { %201 = vrot.lane.b32.xlu1 %v199_v37, %s4364_s3 }
 0x2bf   :  { %v202_v38 = vpop.permute.xlu1 %201 }
 0x2c0   :  { %205 = vst.msk [vmem:[#allocation2] sm:$0x1] %vm204_vm3, %v202_v38  ;;  %3977 = vmatmul.mubr.msk.bf16.vlgmr.msra.gmra.mrb[4].mxu0 %vm129_vm4, %v202_v38 }
 0x2c1   :  { %3989 = vmatpush3.bf16.msra.mxu0 %v4439_v0  ;;  %3992 = vmatprep.mubr.msk.bf16.mxu0 %vm4361_vm2, %v4360_v1 }
 0x2c2   :  { %3990 = vmatprep.subr.bf16.mxu0 %v4360_v1 }
 0x2c5   :  { %3991 = vmatpush3.bf16.msra.mxu0 %v4449_v3 }
 0x2c6   :  { %4004 = vmatprep.subr.bf16.mxu0 %v4360_v1 }
 0x393   :  { %v243_v39 = vpop.f32.mrb[4].mxu0 }
 0x394   :  { %v244_v40 = vadd.f32 %v4482_v10, %v243_v39  ;;  %v3978_v41 = vpop.f32.mrb[5].mxu0 }
 0x395   :  { %v246_v42 = vpop.f32.mrb[6].mxu0 }
 0x396   :  { %v250_v43 = vrot.slane %v244_v40, 6  ;;  %v3979_v44 = vpop.f32.mrb[7].mxu0 }
 0x398   :  { %259 = vrot.lane.b32.xlu0 %v250_v43, %s4363_s19  ;;  %v252_v45 = vadd.f32 %v250_v43, %v4491_v21 }
 0x39a   :  { %v3525_v46 = vmul.f32 -1.442695, %v252_v45 }
 0x39c   :  { %4246 = vpow2.f32 %v3525_v46 }
 0x3a6   :  { %v4247_v47 = vpop.eup %4246 }
 0x3a7   :  { %v256_v48 = vadd.f32 1.0, %v4247_v47 }
 0x3a9   :  { %4248 = vrcp.f32 %v256_v48 }
 0x3b3   :  { %v4249_v49 = vpop.eup %4248 }
 0x3b4   :  { %v269_v56 = vsub.f32 1.0, %v4249_v49  ;;  %v278_v58 = vmul.f32 %v4249_v49, %v276_v55 }
 0x40a   :  { %v260_v50 = vpop.permute.xlu0 %259 }
 0x40b   :  { %v262_v51 = vmul.f32 %v4249_v49, %v260_v50 }
 0x40d   :  { %264 = vrot.lane.b32.xlu1 %v262_v51, %s4363_s19 }
 0x47f   :  { %v265_v52 = vpop.permute.xlu1 %264 }
 0x480   :  { %v267_v53 = vadd.f32 %v265_v52, %v4491_v21 }
 0x482   :  { %4250 = vtanh.f32 %v267_v53 }
 0x48c   :  { %v4251_v54 = vpop.eup %4250 }
 0x48d   :  { %271 = vrot.lane.b32.xlu0 %v4251_v54, %s4364_s3 }
 0x4ff   :  { %v272_v57 = vpop.permute.xlu0 %271 }
 0x500   :  { %v274_v59 = vmul.f32 %v272_v57, %v269_v56 }
 0x502   :  { %v279_v60 = vadd.f32 %v278_v58, %v274_v59 }
 0x504   :  { %v4511_v61 = vpack.c.bf16 %v279_v60, %v279_v60  ;;  %v360_v23 = vrot.slane %v279_v60, 6 }
 0x506   :  { %v287_v62 = vrot.slane %v4511_v61, 1 }
 0x508   :  { %288 = vrot.lane.b32.xlu1 %v287_v62, %s4364_s3 }
 0x57a   :  { %v289_v63 = vpop.permute.xlu1 %288 }
 0x57b   :  { %3985 = vmatmul.mubr.msk.bf16.vlgmr.msra.gmra.mrb[4].mxu1 %vm129_vm4, %v289_v63 }
 0x57c   :  { %3997 = vmatpush3.bf16.msra.mxu1 %v4439_v0  ;;  %4000 = vmatprep.mubr.msk.bf16.mxu1 %vm4361_vm2, %v4360_v1 }
 0x57d   :  { %3998 = vmatprep.subr.bf16.mxu1 %v4360_v1 }
 0x580   :  { %3999 = vmatpush3.bf16.msra.mxu1 %v4449_v3 }
 0x581   :  { %4012 = vmatprep.subr.bf16.mxu1 %v4360_v1 }
 0x64e   :  { %v327_v2 = vpop.f32.mrb[4].mxu1 }
 0x64f   :  { %v328_v4 = vadd.f32 %v4482_v10, %v327_v2  ;;  %v3986_v5 = vpop.f32.mrb[5].mxu1 }
 0x650   :  { %v330_v6 = vpop.f32.mrb[6].mxu1 }
 0x651   :  { %v334_v7 = vrot.slane %v328_v4, 4  ;;  %v3987_v9 = vpop.f32.mrb[7].mxu1 }
 0x653   :  { %343 = vrot.lane.b32.xlu0 %v334_v7, %s4363_s19  ;;  %v336_v11 = vadd.f32 %v334_v7, %v4491_v21 }
 0x655   :  { %v3527_v12 = vmul.f32 -1.442695, %v336_v11 }
 0x657   :  { %4252 = vpow2.f32 %v3527_v12 }
 0x661   :  { %v4253_v13 = vpop.eup %4252 }
 0x662   :  { %v340_v14 = vadd.f32 1.0, %v4253_v13 }
 0x664   :  { %4254 = vrcp.f32 %v340_v14 }
 0x66e   :  { %v4255_v16 = vpop.eup %4254 }
 0x66f   :  { %v353_v24 = vsub.f32 1.0, %v4255_v16  ;;  %v362_v26 = vmul.f32 %v4255_v16, %v360_v23 }
 0x6c5   :  { %v344_v17 = vpop.permute.xlu0 %343 }
 0x6c6   :  { %v346_v18 = vmul.f32 %v4255_v16, %v344_v17 }
 0x6c8   :  { %348 = vrot.lane.b32.xlu1 %v346_v18, %s4363_s19 }
 0x73a   :  { %v349_v19 = vpop.permute.xlu1 %348 }
 0x73b   :  { %v351_v20 = vadd.f32 %v349_v19, %v4491_v21 }
 0x73d   :  { %4256 = vtanh.f32 %v351_v20 }
 0x747   :  { %v4257_v22 = vpop.eup %4256 }
 0x748   :  { %355 = vrot.lane.b32.xlu0 %v4257_v22, %s4364_s3 }
 0x7ba   :  { %v356_v25 = vpop.permute.xlu0 %355 }
 0x7bb   :  { %v358_v27 = vmul.f32 %v356_v25, %v353_v24 }
 0x7bd   :  { %v363_v28 = vadd.f32 %v362_v26, %v358_v27 }
 0x7bf   :  { %v4528_v29 = vpack.c.bf16 %v363_v28, %v363_v28  ;;  %v444_v48 = vrot.slane %v363_v28, 6 }
 0x7c1   :  { %v371_v30 = vrot.slane %v4528_v29, 2 }
 0x7c3   :  { %372 = vrot.lane.b32.xlu1 %v371_v30, %s4364_s3 }
 0x835   :  { %v373_v31 = vpop.permute.xlu1 %372 }
 0x836   :  { %3993 = vmatmul.mubr.msk.bf16.vlgmr.msra.gmra.mrb[8].mxu0 %vm129_vm4, %v373_v31 }
 0x837   :  { %4005 = vmatpush3.bf16.msra.mxu0 %v4439_v0  ;;  %4008 = vmatprep.mubr.msk.bf16.mxu0 %vm4361_vm2, %v4360_v1 }
 0x838   :  { %4006 = vmatprep.subr.bf16.mxu0 %v4360_v1 }
 0x83b   :  { %4007 = vmatpush3.bf16.msra.mxu0 %v4449_v3 }
 0x83c   :  { %4020 = vmatprep.subr.bf16.mxu0 %v4360_v1 }
 0x909   :  { %v411_v32 = vpop.f32.mrb[8].mxu0 }
 0x90a   :  { %v412_v33 = vadd.f32 %v4482_v10, %v411_v32  ;;  %v3994_v34 = vpop.f32.mrb[9].mxu0 }
 0x90b   :  { %v414_v35 = vpop.f32.mrb[10].mxu0 }
 0x90c   :  { %v418_v36 = vrot.slane %v412_v33, 2  ;;  %v3995_v37 = vpop.f32.mrb[11].mxu0 }
 0x90e   :  { %427 = vrot.lane.b32.xlu0 %v418_v36, %s4363_s19  ;;  %v420_v38 = vadd.f32 %v418_v36, %v4491_v21 }
 0x910   :  { %v3529_v39 = vmul.f32 -1.442695, %v420_v38 }
 0x912   :  { %4258 = vpow2.f32 %v3529_v39 }
 0x91c   :  { %v4259_v40 = vpop.eup %4258 }
 0x91d   :  { %v424_v41 = vadd.f32 1.0, %v4259_v40 }
 0x91f   :  { %4260 = vrcp.f32 %v424_v41 }
 0x929   :  { %v4261_v42 = vpop.eup %4260 }
 0x92a   :  { %v437_v49 = vsub.f32 1.0, %v4261_v42  ;;  %v446_v51 = vmul.f32 %v4261_v42, %v444_v48 }
 0x980   :  { %v428_v43 = vpop.permute.xlu0 %427 }
 0x981   :  { %v430_v44 = vmul.f32 %v4261_v42, %v428_v43 }
 0x983   :  { %432 = vrot.lane.b32.xlu1 %v430_v44, %s4363_s19 }
 0x9f5   :  { %v433_v45 = vpop.permute.xlu1 %432 }
 0x9f6   :  { %v435_v46 = vadd.f32 %v433_v45, %v4491_v21 }
 0x9f8   :  { %4262 = vtanh.f32 %v435_v46 }
 0xa02   :  { %v4263_v47 = vpop.eup %4262 }
 0xa03   :  { %439 = vrot.lane.b32.xlu0 %v4263_v47, %s4364_s3 }
 0xa75   :  { %v440_v50 = vpop.permute.xlu0 %439 }
 0xa76   :  { %v442_v52 = vmul.f32 %v440_v50, %v437_v49 }
 0xa78   :  { %v447_v53 = vadd.f32 %v446_v51, %v442_v52 }
 0xa7a   :  { %v4545_v54 = vpack.c.bf16 %v447_v53, %v447_v53  ;;  %v526_v13 = vrot.slane %v447_v53, 6 }
 0xa7c   :  { %v455_v55 = vrot.slane %v4545_v54, 3 }
 0xa7e   :  { %456 = vrot.lane.b32.xlu1 %v455_v55, %s4364_s3 }
 0xaf0   :  { %v457_v56 = vpop.permute.xlu1 %456 }
 0xaf1   :  { %4001 = vmatmul.mubr.msk.bf16.vlgmr.msra.gmra.mrb[8].mxu1 %vm129_vm4, %v457_v56 }
 0xaf2   :  { %4013 = vmatpush3.bf16.msra.mxu1 %v4439_v0  ;;  %4016 = vmatprep.mubr.msk.bf16.mxu1 %vm4361_vm2, %v4360_v1 }
 0xaf3   :  { %4014 = vmatprep.subr.bf16.mxu1 %v4360_v1 }
 0xaf6   :  { %4015 = vmatpush3.bf16.msra.mxu1 %v4449_v3 }
 0xaf7   :  { %4028 = vmatprep.subr.bf16.mxu1 %v4360_v1 }
 0xbc4   :  { %v495_v21 = vpop.f32.mrb[8].mxu1 }
 0xbc5   :  { %v496_v57 = vadd.f32 %v4482_v10, %v495_v21  ;;  %v4002_v58 = vpop.f32.mrb[9].mxu1 }
 0xbc6   :  { %v498_v59 = vpop.f32.mrb[10].mxu1 }
 0xbc7   :  { %509 = vrot.lane.b32.xlu0 %v496_v57, %s4363_s19  ;;  %v4003_v60 = vpop.f32.mrb[11].mxu1  ;;  %v501_v62 = vadd.f32 %v496_v57, %v4487_v15 }
 0xbc9   :  { %v3531_v63 = vmul.f32 -1.442695, %v501_v62 }
 0xbcb   :  { %4264 = vpow2.f32 %v3531_v63 }
 0xbd5   :  { %v4265_v2 = vpop.eup %4264 }
 0xbd6   :  { %v505_v4 = vadd.f32 1.0, %v4265_v2 }
 0xbd8   :  { %4266 = vrcp.f32 %v505_v4 }
 0xbe2   :  { %v4267_v5 = vpop.eup %4266 }
 0xbe3   :  { %v519_v14 = vsub.f32 1.0, %v4267_v5  ;;  %v528_v17 = vmul.f32 %v4267_v5, %v526_v13 }
 0xc39   :  { %v510_v6 = vpop.permute.xlu0 %509 }
 0xc3a   :  { %v512_v7 = vmul.f32 %v4267_v5, %v510_v6 }
 0xc3c   :  { %514 = vrot.lane.b32.xlu1 %v512_v7, %s4363_s19 }
 0xcae   :  { %v515_v9 = vpop.permute.xlu1 %514 }
 0xcaf   :  { %v517_v11 = vadd.f32 %v515_v9, %v4487_v15 }
 0xcb1   :  { %4268 = vtanh.f32 %v517_v11 }
 0xcbb   :  { %v4269_v12 = vpop.eup %4268 }
 0xcbc   :  { %521 = vrot.lane.b32.xlu0 %v4269_v12, %s4364_s3 }
 0xd2e   :  { %v522_v16 = vpop.permute.xlu0 %521 }
 0xd2f   :  { %v524_v18 = vmul.f32 %v522_v16, %v519_v14 }
 0xd31   :  { %v529_v19 = vadd.f32 %v528_v17, %v524_v18 }
 0xd33   :  { %v4562_v20 = vpack.c.bf16 %v529_v19, %v529_v19  ;;  %v610_v38 = vrot.slane %v529_v19, 6 }
 0xd35   :  { %538 = vrot.lane.b32.xlu1 %v4562_v20, %s4364_s3 }
 0xda7   :  { %v539_v22 = vpop.permute.xlu1 %538 }
 0xda8   :  { %4009 = vmatmul.mubr.msk.bf16.vlgmr.msra.gmra.mrb[12].mxu0 %vm129_vm4, %v539_v22 }
 0xda9   :  { %4021 = vmatpush3.bf16.msra.mxu0 %v4439_v0  ;;  %4024 = vmatprep.mubr.msk.bf16.mxu0 %vm4361_vm2, %v4360_v1 }
 0xdaa   :  { %4022 = vmatprep.subr.bf16.mxu0 %v4360_v1 }
 0xdad   :  { %4023 = vmatpush3.bf16.msra.mxu0 %v4449_v3 }
 0xdae   :  { %4036 = vmatprep.subr.bf16.mxu0 %v4360_v1 }
 0xe7b   :  { %v577_v23 = vpop.f32.mrb[12].mxu0 }
 0xe7c   :  { %v578_v24 = vadd.f32 %v4482_v10, %v577_v23  ;;  %v4010_v25 = vpop.f32.mrb[13].mxu0 }
 0xe7d   :  { %v580_v26 = vpop.f32.mrb[14].mxu0 }
 0xe7e   :  { %v584_v27 = vrot.slane %v578_v24, 6  ;;  %v4011_v28 = vpop.f32.mrb[15].mxu0 }
 0xe80   :  { %593 = vrot.lane.b32.xlu0 %v584_v27, %s4363_s19  ;;  %v586_v0 = vadd.f32 %v584_v27, %v4487_v15 }
 0xe82   :  { %v3533_v30 = vmul.f32 -1.442695, %v586_v0 }
 0xe84   :  { %4270 = vpow2.f32 %v3533_v30 }
 0xe8e   :  { %v4271_v31 = vpop.eup %4270 }
 0xe8f   :  { %v590_v32 = vadd.f32 1.0, %v4271_v31 }
 0xe91   :  { %4272 = vrcp.f32 %v590_v32 }
 0xe9b   :  { %v4273_v33 = vpop.eup %4272 }
 0xe9c   :  { %v603_v39 = vsub.f32 1.0, %v4273_v33  ;;  %v612_v41 = vmul.f32 %v4273_v33, %v610_v38 }
 0xef2   :  { %v594_v3 = vpop.permute.xlu0 %593 }
 0xef3   :  { %v596_v34 = vmul.f32 %v4273_v33, %v594_v3 }
 0xef5   :  { %598 = vrot.lane.b32.xlu1 %v596_v34, %s4363_s19 }
 0xf67   :  { %v599_v35 = vpop.permute.xlu1 %598 }
 0xf68   :  { %v601_v36 = vadd.f32 %v599_v35, %v4487_v15 }
 0xf6a   :  { %4274 = vtanh.f32 %v601_v36 }
 0xf74   :  { %v4275_v37 = vpop.eup %4274 }
 0xf75   :  { %605 = vrot.lane.b32.xlu0 %v4275_v37, %s4364_s3 }
 0xfe7   :  { %v606_v40 = vpop.permute.xlu0 %605 }
 0xfe8   :  { %v608_v42 = vmul.f32 %v606_v40, %v603_v39 }
 0xfea   :  { %v613_v43 = vadd.f32 %v612_v41, %v608_v42 }
 0xfec   :  { %v614_v44 = vpack.c.bf16 %v613_v43, %v613_v43  ;;  %v695_v2 = vrot.slane %v613_v43, 6 }
 0xfee   :  { %v622_v45 = vrot.slane %v614_v44, 1 }
 0xff0   :  { %623 = vrot.lane.b32.xlu1 %v622_v45, %s4364_s3 }
0x1062   :  { %v624_v46 = vpop.permute.xlu1 %623 }
0x1063   :  { %4017 = vmatmul.mubr.msk.bf16.vlgmr.msra.gmra.mrb[12].mxu1 %vm129_vm4, %v624_v46 }
0x1064   :  { %4032 = vmatprep.mubr.msk.bf16.mxu1 %vm4361_vm2, %v4360_v1 }
0x1136   :  { %v662_v47 = vpop.f32.mrb[12].mxu1 }
0x1137   :  { %v663_v48 = vadd.f32 %v4482_v10, %v662_v47  ;;  %v4018_v49 = vpop.f32.mrb[13].mxu1  ;;  %v4651_v47 = vld [vmem:[%s5374_s8] ss:$0 sm:$0xff] }
0x1138   :  { %v665_v50 = vpop.f32.mrb[14].mxu1 }
0x1139   :  { %v669_v51 = vrot.slane %v663_v48, 4  ;;  %v4019_v52 = vpop.f32.mrb[15].mxu1 }
0x113b   :  { %678 = vrot.lane.b32.xlu0 %v669_v51, %s4363_s19  ;;  %v671_v53 = vadd.f32 %v669_v51, %v4487_v15 }
0x113d   :  { %v3535_v55 = vmul.f32 -1.442695, %v671_v53 }
0x113f   :  { %4276 = vpow2.f32 %v3535_v55 }
0x1149   :  { %v4277_v56 = vpop.eup %4276 }
0x114a   :  { %v675_v21 = vadd.f32 1.0, %v4277_v56  ;;  %v3538_v56 = vld [vmem:[%s5373_s7] ss:$0 sm:$0xff] }
0x114c   :  { %4278 = vrcp.f32 %v675_v21 }
0x1156   :  { %v4279_v57 = vpop.eup %4278 }
0x1157   :  { %v688_v4 = vsub.f32 1.0, %v4279_v57  ;;  %v697_v6 = vmul.f32 %v4279_v57, %v695_v2 }
0x11ad   :  { %v679_v58 = vpop.permute.xlu0 %678 }
0x11ae   :  { %v681_v59 = vmul.f32 %v4279_v57, %v679_v58 }
0x11b0   :  { %683 = vrot.lane.b32.xlu1 %v681_v59, %s4363_s19 }
0x1222   :  { %v684_v60 = vpop.permute.xlu1 %683 }
0x1223   :  { %v686_v62 = vadd.f32 %v684_v60, %v4487_v15 }
0x1225   :  { %4280 = vtanh.f32 %v686_v62 }
0x122f   :  { %v4281_v63 = vpop.eup %4280 }
0x1230   :  { %690 = vrot.lane.b32.xlu0 %v4281_v63, %s4364_s3 }
0x12a2   :  { %v691_v5 = vpop.permute.xlu0 %690 }
0x12a3   :  { %v693_v7 = vmul.f32 %v691_v5, %v688_v4 }
0x12a5   :  { %v4589_v9 = vadd.f32 %v697_v6, %v693_v7 }
0x12a7   :  { %v699_v11 = vpack.c.bf16 %v4589_v9, %v4589_v9  ;;  %v780_v36 = vrot.slane %v4589_v9, 6 }
0x12a9   :  { %v707_v12 = vrot.slane %v699_v11, 2  ;;  %v701_v35 = vrot.slane %v699_v11, 4 }
0x12ab   :  { %708 = vrot.lane.b32.xlu1 %v707_v12, %s4364_s3 }
0x131d   :  { %v709_v13 = vpop.permute.xlu1 %708 }
0x131e   :  { %4025 = vmatmul.mubr.msk.bf16.vlgmr.msra.gmra.mrb[16].mxu0 %vm129_vm4, %v709_v13 }
0x131f   :  { %4040 = vmatprep.mubr.msk.bf16.mxu0 %vm4361_vm2, %v4360_v1 }
0x13f1   :  { %v747_v14 = vpop.f32.mrb[16].mxu0 }
0x13f2   :  { %v748_v16 = vadd.f32 %v4482_v10, %v747_v14  ;;  %v4026_v17 = vpop.f32.mrb[17].mxu0  ;;  %v616_v10 = vrot.slane %v614_v44, 4 }
0x13f3   :  { %v750_v18 = vpop.f32.mrb[18].mxu0 }
0x13f4   :  { %v754_v19 = vrot.slane %v748_v16, 2  ;;  %v4027_v22 = vpop.f32.mrb[19].mxu0 }
0x13f6   :  { %763 = vrot.lane.b32.xlu0 %v754_v19, %s4363_s19  ;;  %v756_v23 = vadd.f32 %v754_v19, %v4487_v15 }
0x13f8   :  { %v3537_v24 = vmul.f32 -1.442695, %v756_v23 }
0x13fa   :  { %4282 = vpow2.f32 %v3537_v24 }
0x1404   :  { %v4283_v25 = vpop.eup %4282 }
0x1405   :  { %v760_v26 = vadd.f32 1.0, %v4283_v25 }
0x1407   :  { %4284 = vrcp.f32 %v760_v26 }
0x1411   :  { %v4285_v27 = vpop.eup %4284 }
0x1412   :  { %v773_v37 = vsub.f32 1.0, %v4285_v27  ;;  %v782_v39 = vmul.f32 %v4285_v27, %v780_v36 }
0x1468   :  { %v764_v28 = vpop.permute.xlu0 %763 }
0x1469   :  { %v766_v0 = vmul.f32 %v4285_v27, %v764_v28 }
0x146b   :  { %768 = vrot.lane.b32.xlu1 %v766_v0, %s4363_s19 }
0x146f   :  { %282 = vrot.lane.b32.xlu1 %v4511_v61, %s4364_s3  ;;  %v4610_v61 = vld [vmem:[%s5372_s6] sm:$0xff]  }
0x1470   :  { %4037 = vmatpush3.bf16.msra.mxu0 %v4610_v61 }
0x1471   :  { %4038 = vmatprep.subr.bf16.mxu0 %v4360_v1 }
0x1473   :  { %450 = vrot.lane.b32.xlu1 %v4545_v54, %s4364_s3  ;;  %v532_v54 = vrot.slane %v4562_v20, 4  ;;  %v4111_v20 = vld [vmem:[%s5371_s5 + $0x8] sm:$0xff]  }
0x1477   :  { %617 = vrot.lane.b32.xlu1 %v616_v10, %s4364_s3 }
0x14dd   :  { %v769_v30 = vpop.permute.xlu1 %768 }
0x14de   :  { %v771_v31 = vadd.f32 %v769_v30, %v4487_v15  ;;  %v4617_v15 = vld [vmem:[%s5372_s6 + $0x8] sm:$0xff]  }
0x14df   :  { %4039 = vmatpush3.bf16.msra.mxu0 %v4617_v15 }
0x14e0   :  { %4286 = vtanh.f32 %v771_v31  ;;  %4052 = vmatprep.subr.bf16.mxu0 %v4360_v1 }
0x14e1   :  { %v283_v32 = vpop.permute.xlu1 %282 }
0x14e2   :  { %286 = vst.msk [vmem:[#allocation2] sm:$0x2] %vm285_vm5, %v283_v32  ;;  %4041 = vmatmul.mubr.bf16.vlgmr.msra.gmra.mrb[20].mxu0 %v4362_v8 }
0x14e3   :  { %4053 = vmatpush3.bf16.msra.mxu0 %v4610_v61  ;;  %4056 = vmatprep.mubr.msk.bf16.mxu0 %vm4361_vm2, %v4360_v1 }
0x14e4   :  { %4054 = vmatprep.subr.bf16.mxu0 %v4360_v1 }
0x14e5   :  { %v451_v33 = vpop.permute.xlu1 %450 }
0x14e6   :  { %454 = vst.msk [vmem:[#allocation2] sm:$0x8] %vm453_vm6, %v451_v33 }
0x14e7   :  { %4055 = vmatpush3.bf16.msra.mxu0 %v4617_v15 }
0x14e8   :  { %4068 = vmatprep.subr.bf16.mxu0 %v4360_v1 }
0x14e9   :  { %v618_v3 = vpop.permute.xlu1 %617 }
0x14ea   :  { %v4287_v34 = vpop.eup %4286  ;;  %621 = vst.msk [vmem:[#allocation2] sm:$0x20] %vm620_vm7, %v618_v3 }
0x14eb   :  { %775 = vrot.lane.b32.xlu0 %v4287_v34, %s4364_s3 }
0x14ef   :  { %366 = vrot.lane.b32.xlu0 %v4528_v29, %s4364_s3  ;;  %v4110_v29 = vld [vmem:[%s5371_s5] sm:$0xff]  }
0x14f0   :  { %4029 = vmatpush3.bf16.msra.mxu1 %v4110_v29 }
0x14f1   :  { %4030 = vmatprep.subr.bf16.mxu1 %v4360_v1 }
0x14f3   :  { %533 = vrot.lane.b32.xlu0 %v532_v54, %s4364_s3 }
0x14f4   :  { %4031 = vmatpush3.bf16.msra.mxu1 %v4111_v20 }
0x14f5   :  { %4044 = vmatprep.subr.bf16.mxu1 %v4360_v1 }
0x14f7   :  { %702 = vrot.lane.b32.xlu0 %v701_v35, %s4364_s3 }
0x155d   :  { %v776_v38 = vpop.permute.xlu0 %775 }
0x155e   :  { %v778_v40 = vmul.f32 %v776_v38, %v773_v37 }
0x1560   :  { %v4643_v41 = vadd.f32 %v782_v39, %v778_v40 }
0x1561   :  { %v367_v42 = vpop.permute.xlu0 %366 }
0x1562   :  { %370 = vst.msk [vmem:[#allocation2] sm:$0x4] %vm369_vm8, %v367_v42  ;;  %v784_v43 = vpack.c.bf16 %v4643_v41, %v4643_v41 }
0x1564   :  { %v786_v44 = vrot.slane %v784_v43, 4 }
0x1565   :  { %v534_v45 = vpop.permute.xlu0 %533 }
0x1566   :  { %537 = vst.msk [vmem:[#allocation2] sm:$0x10] %vm536_vm9, %v534_v45  ;;  %787 = vrot.lane.b32.xlu1 %v786_v44, %s4364_s3 }
0x1569   :  { %v703_v46 = vpop.permute.xlu0 %702 }
0x156a   :  { %706 = vst.msk [vmem:[#allocation2] sm:$0x40] %vm705_vm10, %v703_v46 }
0x15b5   :  { %v923_v48 = vpop.f32.mrb[20].mxu0 }
0x15b6   :  { %v924_v49 = vadd.f32 %v4651_v47, %v923_v48  ;;  %v4042_v50 = vpop.f32.mrb[21].mxu0 }
0x15b7   :  { %v926_v51 = vpop.f32.mrb[22].mxu0 }
0x15b8   :  { %v4043_v52 = vpop.f32.mrb[23].mxu0  ;;  %937 = vrot.lane.b32.xlu0 %v924_v49, %s4363_s19 }
0x15d8   :  { %v788_v53 = vpop.permute.xlu1 %787 }
0x15d9   :  { %791 = vst.msk [vmem:[#allocation2] sm:$0x80] %vm790_vm11, %v788_v53 }
0x15e0   :  { %v798_v55 = vld [vmem:[#allocation2] sm:$0xff] }
0x15e1   :  { %4033 = vmatmul.mubr.msk.bf16.vlgmr.msra.gmra.mrb[16].mxu1 %vm129_vm4, %v798_v55 }
0x15e2   :  { %4045 = vmatpush3.bf16.msra.mxu1 %v4610_v61  ;;  %4048 = vmatprep.mubr.msk.bf16.mxu1 %vm4361_vm2, %v4360_v1 }
0x15e3   :  { %4046 = vmatprep.subr.bf16.mxu1 %v4360_v1 }
0x15e6   :  { %4047 = vmatpush3.bf16.msra.mxu1 %v4617_v15 }
0x15e7   :  { %4060 = vmatprep.subr.bf16.mxu1 %v4360_v1 }
0x162a   :  { %v938_v6 = vpop.permute.xlu0 %937 }
0x16b4   :  { %v864_v21 = vpop.f32.mrb[16].mxu1 }
0x16b5   :  { %v4665_v57 = vadd.f32 %v3538_v56, %v864_v21  ;;  %v4034_v58 = vpop.f32.mrb[17].mxu1 }
0x16b6   :  { %v867_v59 = vpop.f32.mrb[18].mxu1 }
0x16b7   :  { %v4667_v60 = vadd.f32 %v3538_v56, %v867_v59  ;;  %v4035_v62 = vpop.f32.mrb[19].mxu1  ;;  %v929_v63 = vadd.f32 %v924_v49, %v4665_v57 }
0x16b9   :  { %v3545_v2 = vmul.f32 -1.442695, %v929_v63 }
0x16bb   :  { %4288 = vpow2.f32 %v3545_v2 }
0x16c5   :  { %v4289_v4 = vpop.eup %4288 }
0x16c6   :  { %v933_v5 = vadd.f32 1.0, %v4289_v4 }
0x16c8   :  { %4290 = vrcp.f32 %v933_v5 }
0x16d2   :  { %v4291_v7 = vpop.eup %4290 }
0x16d3   :  { %v940_v9 = vmul.f32 %v4291_v7, %v938_v6  ;;  %v947_v14 = vsub.f32 1.0, %v4291_v7  ;;  %v953_v17 = vmul.f32 0.0, %v4291_v7 }
0x16d5   :  { %942 = vrot.lane.b32.xlu1 %v940_v9, %s4363_s19 }
0x1747   :  { %v943_v11 = vpop.permute.xlu1 %942 }
0x1748   :  { %v945_v12 = vadd.f32 %v943_v11, %v4665_v57 }
0x174a   :  { %4292 = vtanh.f32 %v945_v12 }
0x1754   :  { %v4293_v13 = vpop.eup %4292 }
0x1755   :  { %949 = vrot.lane.b32.xlu0 %v4293_v13, %s4364_s3 }
0x17c7   :  { %v950_v16 = vpop.permute.xlu0 %949 }
0x17c8   :  { %v952_v18 = vmul.f32 %v950_v16, %v947_v14 }
0x17ca   :  { %v954_v19 = vadd.f32 %v953_v17, %v952_v18 }
0x17cc   :  { %v955_v22 = vpack.c.bf16 %v954_v19, %v954_v19  ;;  %v1029_v20 = vrot.slane %v954_v19, 6 }
0x17ce   :  { %957 = vrot.lane.b32.xlu1 %v955_v22, %s4364_s3 }
0x1840   :  { %v958_v23 = vpop.permute.xlu1 %957 }
0x1841   :  { %4049 = vmatmul.mubr.msk.bf16.vlgmr.msra.gmra.mrb[20].mxu1 %vm129_vm4, %v958_v23 }
0x1842   :  { %4061 = vmatpush3.bf16.msra.mxu1 %v4610_v61  ;;  %4064 = vmatprep.mubr.msk.bf16.mxu1 %vm4361_vm2, %v4360_v1 }
0x1843   :  { %4062 = vmatprep.subr.bf16.mxu1 %v4360_v1 }
0x1846   :  { %4063 = vmatpush3.bf16.msra.mxu1 %v4617_v15 }
0x1847   :  { %4076 = vmatprep.subr.bf16.mxu1 %v4360_v1 }
0x1914   :  { %v996_v24 = vpop.f32.mrb[20].mxu1 }
0x1915   :  { %v997_v25 = vadd.f32 %v4651_v47, %v996_v24  ;;  %v4050_v26 = vpop.f32.mrb[21].mxu1 }
0x1916   :  { %v999_v27 = vpop.f32.mrb[22].mxu1 }
0x1917   :  { %v1003_v28 = vrot.slane %v997_v25, 6  ;;  %v4051_v0 = vpop.f32.mrb[23].mxu1 }
0x1919   :  { %1012 = vrot.lane.b32.xlu0 %v1003_v28, %s4363_s19  ;;  %v1005_v10 = vadd.f32 %v1003_v28, %v4665_v57 }
0x191b   :  { %v3547_v30 = vmul.f32 -1.442695, %v1005_v10 }
0x191d   :  { %4294 = vpow2.f32 %v3547_v30 }
0x1927   :  { %v4295_v31 = vpop.eup %4294 }
0x1928   :  { %v1009_v32 = vadd.f32 1.0, %v4295_v31 }
0x192a   :  { %4296 = vrcp.f32 %v1009_v32 }
0x1934   :  { %v4297_v33 = vpop.eup %4296 }
0x1935   :  { %v1022_v36 = vsub.f32 1.0, %v4297_v33  ;;  %v1031_v38 = vmul.f32 %v4297_v33, %v1029_v20 }
0x198b   :  { %v1013_v3 = vpop.permute.xlu0 %1012 }
0x198c   :  { %v1015_v34 = vmul.f32 %v4297_v33, %v1013_v3 }
0x198e   :  { %1017 = vrot.lane.b32.xlu1 %v1015_v34, %s4363_s19 }
0x1a00   :  { %v1018_v54 = vpop.permute.xlu1 %1017 }
0x1a01   :  { %v1020_v35 = vadd.f32 %v1018_v54, %v4665_v57 }
0x1a03   :  { %4298 = vtanh.f32 %v1020_v35 }
0x1a0d   :  { %v4299_v29 = vpop.eup %4298 }
0x1a0e   :  { %1024 = vrot.lane.b32.xlu0 %v4299_v29, %s4364_s3 }
0x1a80   :  { %v1025_v37 = vpop.permute.xlu0 %1024 }
0x1a81   :  { %v1027_v39 = vmul.f32 %v1025_v37, %v1022_v36 }
0x1a83   :  { %v1032_v40 = vadd.f32 %v1031_v38, %v1027_v39 }
0x1a85   :  { %v1033_v42 = vpack.c.bf16 %v1032_v40, %v1032_v40  ;;  %v1108_v4 = vrot.slane %v1032_v40, 6 }
0x1a87   :  { %v1035_v43 = vrot.slane %v1033_v42, 1 }
0x1a89   :  { %1036 = vrot.lane.b32.xlu1 %v1035_v43, %s4364_s3 }
0x1afb   :  { %v1037_v44 = vpop.permute.xlu1 %1036 }
0x1afc   :  { %4057 = vmatmul.mubr.msk.bf16.vlgmr.msra.gmra.mrb[24].mxu0 %vm129_vm4, %v1037_v44 }
0x1afd   :  { %4069 = vmatpush3.bf16.msra.mxu0 %v4610_v61  ;;  %4072 = vmatprep.mubr.msk.bf16.mxu0 %vm4361_vm2, %v4360_v1 }
0x1afe   :  { %4070 = vmatprep.subr.bf16.mxu0 %v4360_v1 }
0x1b01   :  { %4071 = vmatpush3.bf16.msra.mxu0 %v4617_v15 }
0x1b02   :  { %4084 = vmatprep.subr.bf16.mxu0 %v4360_v1 }
0x1bcf   :  { %v1075_v45 = vpop.f32.mrb[24].mxu0 }
0x1bd0   :  { %v1076_v46 = vadd.f32 %v4651_v47, %v1075_v45  ;;  %v4058_v48 = vpop.f32.mrb[25].mxu0 }
0x1bd1   :  { %v1078_v49 = vpop.f32.mrb[26].mxu0 }
0x1bd2   :  { %v1082_v50 = vrot.slane %v1076_v46, 4  ;;  %v4059_v51 = vpop.f32.mrb[27].mxu0 }
0x1bd4   :  { %1091 = vrot.lane.b32.xlu0 %v1082_v50, %s4363_s19  ;;  %v1084_v52 = vadd.f32 %v1082_v50, %v4665_v57 }
0x1bd6   :  { %v3549_v53 = vmul.f32 -1.442695, %v1084_v52 }
0x1bd8   :  { %4300 = vpow2.f32 %v3549_v53 }
0x1be2   :  { %v4301_v55 = vpop.eup %4300 }
0x1be3   :  { %v1088_v56 = vadd.f32 1.0, %v4301_v55 }
0x1be5   :  { %4302 = vrcp.f32 %v1088_v56 }
0x1bef   :  { %v4303_v21 = vpop.eup %4302 }
0x1bf0   :  { %v1101_v5 = vsub.f32 1.0, %v4303_v21  ;;  %v1110_v7 = vmul.f32 %v4303_v21, %v1108_v4 }
0x1c46   :  { %v1092_v58 = vpop.permute.xlu0 %1091 }
0x1c47   :  { %v1094_v59 = vmul.f32 %v4303_v21, %v1092_v58 }
0x1c49   :  { %1096 = vrot.lane.b32.xlu1 %v1094_v59, %s4363_s19 }
0x1cbb   :  { %v1097_v62 = vpop.permute.xlu1 %1096 }
0x1cbc   :  { %v1099_v63 = vadd.f32 %v1097_v62, %v4665_v57 }
0x1cbe   :  { %4304 = vtanh.f32 %v1099_v63 }
0x1cc8   :  { %v4305_v2 = vpop.eup %4304 }
0x1cc9   :  { %1103 = vrot.lane.b32.xlu0 %v4305_v2, %s4364_s3 }
0x1d3b   :  { %v1104_v6 = vpop.permute.xlu0 %1103 }
0x1d3c   :  { %v1106_v9 = vmul.f32 %v1104_v6, %v1101_v5 }
0x1d3e   :  { %v1111_v11 = vadd.f32 %v1110_v7, %v1106_v9 }
0x1d40   :  { %v1112_v12 = vpack.c.bf16 %v1111_v11, %v1111_v11  ;;  %v1187_v33 = vrot.slane %v1111_v11, 6 }
0x1d42   :  { %v1114_v13 = vrot.slane %v1112_v12, 2 }
0x1d44   :  { %1115 = vrot.lane.b32.xlu1 %v1114_v13, %s4364_s3 }
0x1db6   :  { %v1116_v14 = vpop.permute.xlu1 %1115 }
0x1db7   :  { %4065 = vmatmul.mubr.msk.bf16.vlgmr.msra.gmra.mrb[24].mxu1 %vm129_vm4, %v1116_v14 }
0x1db8   :  { %4077 = vmatpush3.bf16.msra.mxu1 %v4610_v61  ;;  %4080 = vmatprep.mubr.msk.bf16.mxu1 %vm4361_vm2, %v4360_v1 }
0x1db9   :  { %4078 = vmatprep.subr.bf16.mxu1 %v4360_v1 }
0x1dbc   :  { %4079 = vmatpush3.bf16.msra.mxu1 %v4617_v15 }
0x1dbd   :  { %4092 = vmatprep.subr.bf16.mxu1 %v4360_v1 }
0x1e8a   :  { %v1154_v16 = vpop.f32.mrb[24].mxu1 }
0x1e8b   :  { %v1155_v17 = vadd.f32 %v4651_v47, %v1154_v16  ;;  %v4066_v18 = vpop.f32.mrb[25].mxu1 }
0x1e8c   :  { %v1157_v19 = vpop.f32.mrb[26].mxu1 }
0x1e8d   :  { %v1161_v22 = vrot.slane %v1155_v17, 2  ;;  %v4067_v23 = vpop.f32.mrb[27].mxu1 }
0x1e8f   :  { %1170 = vrot.lane.b32.xlu0 %v1161_v22, %s4363_s19  ;;  %v1163_v24 = vadd.f32 %v1161_v22, %v4665_v57 }
0x1e91   :  { %v3551_v25 = vmul.f32 -1.442695, %v1163_v24 }
0x1e93   :  { %4306 = vpow2.f32 %v3551_v25 }
0x1e9d   :  { %v4307_v26 = vpop.eup %4306 }
0x1e9e   :  { %v1167_v27 = vadd.f32 1.0, %v4307_v26 }
0x1ea0   :  { %4308 = vrcp.f32 %v1167_v27 }
0x1eaa   :  { %v4309_v28 = vpop.eup %4308 }
0x1eab   :  { %v1180_v3 = vsub.f32 1.0, %v4309_v28  ;;  %v1189_v54 = vmul.f32 %v4309_v28, %v1187_v33 }
0x1f01   :  { %v1171_v0 = vpop.permute.xlu0 %1170 }
0x1f02   :  { %v1173_v10 = vmul.f32 %v4309_v28, %v1171_v0 }
0x1f04   :  { %1175 = vrot.lane.b32.xlu1 %v1173_v10, %s4363_s19 }
0x1f76   :  { %v1176_v30 = vpop.permute.xlu1 %1175 }
0x1f77   :  { %v1178_v31 = vadd.f32 %v1176_v30, %v4665_v57 }
0x1f79   :  { %4310 = vtanh.f32 %v1178_v31 }
0x1f83   :  { %v4311_v32 = vpop.eup %4310 }
0x1f84   :  { %1182 = vrot.lane.b32.xlu0 %v4311_v32, %s4364_s3 }
0x1ff6   :  { %v1183_v34 = vpop.permute.xlu0 %1182 }
0x1ff7   :  { %v1185_v35 = vmul.f32 %v1183_v34, %v1180_v3 }
0x1ff9   :  { %v1190_v29 = vadd.f32 %v1189_v54, %v1185_v35 }
0x1ffb   :  { %v1191_v20 = vpack.c.bf16 %v1190_v29, %v1190_v29  ;;  %v1264_v55 = vrot.slane %v1190_v29, 6 }
0x1ffd   :  { %v1193_v36 = vrot.slane %v1191_v20, 3 }
0x1fff   :  { %1194 = vrot.lane.b32.xlu1 %v1193_v36, %s4364_s3 }
0x2071   :  { %v1195_v37 = vpop.permute.xlu1 %1194 }
0x2072   :  { %4073 = vmatmul.mubr.msk.bf16.vlgmr.msra.gmra.mrb[28].mxu0 %vm129_vm4, %v1195_v37 }
0x2073   :  { %4085 = vmatpush3.bf16.msra.mxu0 %v4610_v61  ;;  %4088 = vmatprep.mubr.msk.bf16.mxu0 %vm4361_vm2, %v4360_v1 }
0x2074   :  { %4086 = vmatprep.subr.bf16.mxu0 %v4360_v1 }
0x2077   :  { %4087 = vmatpush3.bf16.msra.mxu0 %v4617_v15 }
0x2145   :  { %v1233_v57 = vpop.f32.mrb[28].mxu0 }
0x2146   :  { %v1234_v38 = vadd.f32 %v4651_v47, %v1233_v57  ;;  %v4074_v39 = vpop.f32.mrb[29].mxu0 }
0x2147   :  { %v1236_v40 = vpop.f32.mrb[30].mxu0 }
0x2148   :  { %1247 = vrot.lane.b32.xlu0 %v1234_v38, %s4363_s19  ;;  %v4075_v42 = vpop.f32.mrb[31].mxu0  ;;  %v1239_v43 = vadd.f32 %v1234_v38, %v4667_v60 }
0x214a   :  { %v3553_v44 = vmul.f32 -1.442695, %v1239_v43 }
0x214c   :  { %4312 = vpow2.f32 %v3553_v44 }
0x2156   :  { %v4313_v45 = vpop.eup %4312 }
0x2157   :  { %v1243_v46 = vadd.f32 1.0, %v4313_v45 }
0x2159   :  { %4314 = vrcp.f32 %v1243_v46 }
0x2163   :  { %v4315_v48 = vpop.eup %4314 }
0x2164   :  { %v1257_v56 = vsub.f32 1.0, %v4315_v48  ;;  %v1266_v58 = vmul.f32 %v4315_v48, %v1264_v55 }
0x21ba   :  { %v1248_v49 = vpop.permute.xlu0 %1247 }
0x21bb   :  { %v1250_v50 = vmul.f32 %v4315_v48, %v1248_v49 }
0x21bd   :  { %1252 = vrot.lane.b32.xlu1 %v1250_v50, %s4363_s19 }
0x222f   :  { %v1253_v51 = vpop.permute.xlu1 %1252 }
0x2230   :  { %v1255_v52 = vadd.f32 %v1253_v51, %v4667_v60 }
0x2232   :  { %4316 = vtanh.f32 %v1255_v52 }
0x223c   :  { %v4317_v53 = vpop.eup %4316 }
0x223d   :  { %1259 = vrot.lane.b32.xlu0 %v4317_v53, %s4364_s3 }
0x22af   :  { %v1260_v21 = vpop.permute.xlu0 %1259 }
0x22b0   :  { %v1262_v59 = vmul.f32 %v1260_v21, %v1257_v56 }
0x22b2   :  { %v1267_v62 = vadd.f32 %v1266_v58, %v1262_v59 }
0x22b4   :  { %v1268_v63 = vpack.c.bf16 %v1267_v62, %v1267_v62  ;;  %v1342_v22 = vrot.slane %v1267_v62, 6 }
0x22b6   :  { %1270 = vrot.lane.b32.xlu1 %v1268_v63, %s4364_s3 }
0x2328   :  { %v1271_v2 = vpop.permute.xlu1 %1270 }
0x2329   :  { %4081 = vmatmul.mubr.msk.bf16.vlgmr.msra.gmra.mrb[28].mxu1 %vm129_vm4, %v1271_v2 }
0x232a   :  { %4093 = vmatpush3.bf16.msra.mxu1 %v4610_v61  ;;  %4096 = vmatprep.mubr.msk.bf16.mxu1 %vm4361_vm2, %v4360_v1 }
0x232b   :  { %4094 = vmatprep.subr.bf16.mxu1 %v4360_v1 }
0x232e   :  { %4095 = vmatpush3.bf16.msra.mxu1 %v4617_v15 }
0x23fc   :  { %v1309_v4 = vpop.f32.mrb[28].mxu1 }
0x23fd   :  { %v1310_v5 = vadd.f32 %v4651_v47, %v1309_v4  ;;  %v4082_v6 = vpop.f32.mrb[29].mxu1 }
0x23fe   :  { %v1312_v7 = vpop.f32.mrb[30].mxu1 }
0x23ff   :  { %v1316_v9 = vrot.slane %v1310_v5, 6  ;;  %v4083_v11 = vpop.f32.mrb[31].mxu1 }
0x2401   :  { %1325 = vrot.lane.b32.xlu0 %v1316_v9, %s4363_s19  ;;  %v1318_v12 = vadd.f32 %v1316_v9, %v4667_v60 }
0x2403   :  { %v3555_v13 = vmul.f32 -1.442695, %v1318_v12  ;;  %v1512_v12 = vld [vmem:[%s5375_s9] sm:$0xff] }
0x2405   :  { %4318 = vpow2.f32 %v3555_v13  ;;  %v1520_v13 = vld [vmem:[%s5375_s9 + $0x40] sm:$0xff] }
0x240f   :  { %v4319_v61 = vpop.eup %4318 }
0x2410   :  { %v1322_v14 = vadd.f32 1.0, %v4319_v61  ;;  %v3561_v61 = vcombine.high %v1512_v12, %v1520_v13 }
0x2412   :  { %4320 = vrcp.f32 %v1322_v14  ;;  %v1521_v14 = vld [vmem:[%s5375_s9 + $0x48] sm:$0xff]  ;;  %1791 = vmatprep.subr.bf16.mxu0 %v3561_v61  ;;  %v1543_v61 = vld [vmem:[%s5375_s9 + $0xf8] sm:$0xff] }
0x241c   :  { %v4321_v16 = vpop.eup %4320 }
0x241d   :  { %v1335_v23 = vsub.f32 1.0, %v4321_v16  ;;  %v1344_v25 = vmul.f32 %v4321_v16, %v1342_v22  ;;  %v1537_v22 = vld [vmem:[%s5375_s9 + $0xc8] sm:$0xff] }
0x2473   :  { %v1326_v1 = vpop.permute.xlu0 %1325 }
0x2474   :  { %v1328_v17 = vmul.f32 %v4321_v16, %v1326_v1  ;;  %v1528_v16 = vld [vmem:[%s5375_s9 + $0x80] sm:$0xff] }
0x2475   :  { %v1536_v1 = vld [vmem:[%s5375_s9 + $0xc0] sm:$0xff] }
0x2476   :  { %1330 = vrot.lane.b32.xlu1 %v1328_v17, %s4363_s19 }
0x24e8   :  { %v1331_v15 = vpop.permute.xlu1 %1330 }
0x24e9   :  { %v1333_v18 = vadd.f32 %v1331_v15, %v4667_v60 }
0x24eb   :  { %4322 = vtanh.f32 %v1333_v18  ;;  %v3577_v18 = vcombine.high %v1528_v16, %v1536_v1 }
0x24f5   :  { %v4323_v19 = vpop.eup %4322 }
0x24f6   :  { %1337 = vrot.lane.b32.xlu0 %v4323_v19, %s4364_s3  ;;  %v1529_v19 = vld [vmem:[%s5375_s9 + $0x88] sm:$0xff] }
0x2568   :  { %v1338_v24 = vpop.permute.xlu0 %1337 }
0x2569   :  { %v1340_v26 = vmul.f32 %v1338_v24, %v1335_v23  ;;  %v3579_v23 = vcombine.high %v1529_v19, %v1537_v22  ;;  %v3576_v24 = vcombine.low %v1528_v16, %v1536_v1 }
0x256b   :  { %v1345_v27 = vadd.f32 %v1344_v25, %v1340_v26  ;;  %v3578_v25 = vcombine.low %v1529_v19, %v1537_v22  ;;  %v4112_v19 = vld [vmem:[%s5377_s11 + $0x40] sm:$0xff]  }
0x256c   :  { %v4113_v22 = vld [vmem:[%s5377_s11 + $0xc0] sm:$0xff]  }
0x256d   :  { %v1346_v28 = vpack.c.bf16 %v1345_v27, %v1345_v27  ;;  %v1421_v42 = vrot.slane %v1345_v27, 6 }
0x256f   :  { %v1348_v0 = vrot.slane %v1346_v28, 1 }
0x2571   :  { %1349 = vrot.lane.b32.xlu1 %v1348_v0, %s4364_s3 }
0x25e3   :  { %v1350_v10 = vpop.permute.xlu1 %1349 }
0x25e4   :  { %4089 = vmatmul.mubr.msk.bf16.vlgmr.msra.gmra.mrb[32].mxu0 %vm129_vm4, %v1350_v10 }
0x25e5   :  { %1823 = vmatprep.mubr.bf16.mxu0 %v4362_v8 }
0x26b7   :  { %v1388_v30 = vpop.f32.mrb[32].mxu0 }
0x26b8   :  { %v1389_v31 = vadd.f32 %v4651_v47, %v1388_v30  ;;  %v4090_v32 = vpop.f32.mrb[33].mxu0  ;;  %v1514_v30 = vld [vmem:[%s5375_s9 + $0x10] sm:$0xff] }
0x26b9   :  { %v1391_v33 = vpop.f32.mrb[34].mxu0  ;;  %v1515_v32 = vld [vmem:[%s5375_s9 + $0x18] sm:$0xff] }
0x26ba   :  { %v1395_v3 = vrot.slane %v1389_v31, 4  ;;  %v4091_v34 = vpop.f32.mrb[35].mxu0  ;;  %v1522_v31 = vld [vmem:[%s5375_s9 + $0x50] sm:$0xff] }
0x26bb   :  { %v3565_v33 = vcombine.high %v1514_v30, %v1522_v31 }
0x26bc   :  { %1404 = vrot.lane.b32.xlu0 %v1395_v3, %s4363_s19  ;;  %v1397_v54 = vadd.f32 %v1395_v3, %v4667_v60  ;;  %v1523_v3 = vld [vmem:[%s5375_s9 + $0x58] sm:$0xff] }
0x26be   :  { %v3557_v35 = vmul.f32 -1.442695, %v1397_v54  ;;  %v3564_v54 = vcombine.low %v1514_v30, %v1522_v31  ;;  %v4123_v30 = vld [vmem:[%s5377_s11 + $0x90] sm:$0xff]   ;;  %v4124_v31 = vld [vmem:[%s5377_s11 + $0x58] sm:$0xff]  }
0x26c0   :  { %4324 = vpow2.f32 %v3557_v35  ;;  %v3566_v35 = vcombine.low %v1515_v32, %v1523_v3 }
0x26ca   :  { %v4325_v29 = vpop.eup %4324 }
0x26cb   :  { %v1401_v20 = vadd.f32 1.0, %v4325_v29  ;;  %v3567_v29 = vcombine.high %v1515_v32, %v1523_v3  ;;  %v4125_v32 = vld [vmem:[%s5377_s11 + $0xd8] sm:$0xff]  }
0x26cc   :  { %v4127_v3 = vld [vmem:[%s5377_s11 + $0x98] sm:$0xff]  }
0x26cd   :  { %4326 = vrcp.f32 %v1401_v20 }
0x26d7   :  { %v4327_v36 = vpop.eup %4326 }
0x26d8   :  { %v1414_v43 = vsub.f32 1.0, %v4327_v36  ;;  %v1423_v45 = vmul.f32 %v4327_v36, %v1421_v42 }
0x272e   :  { %v1405_v37 = vpop.permute.xlu0 %1404 }
0x272f   :  { %v1407_v57 = vmul.f32 %v4327_v36, %v1405_v37  ;;  %v1530_v36 = vld [vmem:[%s5375_s9 + $0x90] sm:$0xff] }
0x2730   :  { %v1538_v37 = vld [vmem:[%s5375_s9 + $0xd0] sm:$0xff] }
0x2731   :  { %1409 = vrot.lane.b32.xlu1 %v1407_v57, %s4363_s19 }
0x27a3   :  { %v1410_v38 = vpop.permute.xlu1 %1409 }
0x27a4   :  { %v1412_v39 = vadd.f32 %v1410_v38, %v4667_v60  ;;  %v1531_v38 = vld [vmem:[%s5375_s9 + $0x98] sm:$0xff] }
0x27a6   :  { %4328 = vtanh.f32 %v1412_v39  ;;  %v1539_v39 = vld [vmem:[%s5375_s9 + $0xd8] sm:$0xff] }
0x27b0   :  { %v4329_v40 = vpop.eup %4328 }
0x27b1   :  { %1416 = vrot.lane.b32.xlu0 %v4329_v40, %s4364_s3 }
0x2823   :  { %v1417_v44 = vpop.permute.xlu0 %1416 }
0x2824   :  { %v1419_v46 = vmul.f32 %v1417_v44, %v1414_v43  ;;  %v3581_v43 = vcombine.high %v1530_v36, %v1538_v37  ;;  %v3583_v44 = vcombine.high %v1531_v38, %v1539_v39 }
0x2826   :  { %v1424_v48 = vadd.f32 %v1423_v45, %v1419_v46  ;;  %v1516_v45 = vld [vmem:[%s5375_s9 + $0x20] sm:$0xff] }
0x2827   :  { %v1524_v46 = vld [vmem:[%s5375_s9 + $0x60] sm:$0xff] }
0x2828   :  { %v1425_v49 = vpack.c.bf16 %v1424_v48, %v1424_v48  ;;  %v1500_v26 = vrot.slane %v1424_v48, 6  ;;  %v1517_v48 = vld [vmem:[%s5375_s9 + $0x28] sm:$0xff] }
0x282a   :  { %v1427_v50 = vrot.slane %v1425_v49, 2  ;;  %v1525_v49 = vld [vmem:[%s5375_s9 + $0x68] sm:$0xff] }
0x282c   :  { %1428 = vrot.lane.b32.xlu1 %v1427_v50, %s4364_s3  ;;  %v3580_v50 = vcombine.low %v1530_v36, %v1538_v37  ;;  %v4133_v36 = vld [vmem:[%s5377_s11 + $0xe8] sm:$0xff]  }
0x282d   :  { %v4134_v37 = vld [vmem:[%s5377_s11 + $0x28] sm:$0xff]  }
0x289e   :  { %v1429_v51 = vpop.permute.xlu1 %1428 }
0x289f   :  { %4097 = vmatmul.mubr.msk.bf16.vlgmr.msra.gmra.mrb[32].mxu1 %vm129_vm4, %v1429_v51  ;;  %v3582_v51 = vcombine.low %v1531_v38, %v1539_v39  ;;  %v4136_v38 = vld [vmem:[%s5377_s11 + $0x70] sm:$0xff]  }
0x28a0   :  { %1864 = vmatprep.mubr.bf16.mxu1 %v4362_v8  ;;  %v4137_v39 = vld [vmem:[%s5377_s11 + $0xf0] sm:$0xff]  }
0x2972   :  { %v1467_v52 = vpop.f32.mrb[32].mxu1 }
0x2973   :  { %v1468_v53 = vadd.f32 %v4651_v47, %v1467_v52  ;;  %v4098_v55 = vpop.f32.mrb[33].mxu1  ;;  %v3569_v52 = vcombine.high %v1516_v45, %v1524_v46 }
0x2974   :  { %v1470_v56 = vpop.f32.mrb[34].mxu1  ;;  %v1532_v55 = vld [vmem:[%s5375_s9 + $0xa0] sm:$0xff] }
0x2975   :  { %v1474_v21 = vrot.slane %v1468_v53, 2  ;;  %v4099_v58 = vpop.f32.mrb[35].mxu1  ;;  %v3571_v53 = vcombine.high %v1517_v48, %v1525_v49  ;;  %v1540_v56 = vld [vmem:[%s5375_s9 + $0xe0] sm:$0xff] }
0x2976   :  { %v1541_v58 = vld [vmem:[%s5375_s9 + $0xe8] sm:$0xff] }
0x2977   :  { %1483 = vrot.lane.b32.xlu0 %v1474_v21, %s4363_s19  ;;  %v1476_v59 = vadd.f32 %v1474_v21, %v4667_v60  ;;  %v1533_v21 = vld [vmem:[%s5375_s9 + $0xa8] sm:$0xff] }
0x2979   :  { %v3559_v62 = vmul.f32 -1.442695, %v1476_v59  ;;  %v3568_v59 = vcombine.low %v1516_v45, %v1524_v46  ;;  %v4142_v45 = vld [vmem:[%s5377_s11 + $0x38] sm:$0xff]  }
0x297a   :  { %v4143_v46 = vld [vmem:[%s5377_s11 + $0xb8] sm:$0xff]  }
0x297b   :  { %4330 = vpow2.f32 %v3559_v62  ;;  %v3570_v62 = vcombine.low %v1517_v48, %v1525_v49  ;;  %v4144_v48 = vld [vmem:[%s5377_s11 + $0x140] sm:$0xff]  }
0x297c   :  { %v4145_v49 = vld [vmem:[%s5377_s11 + $0x1c0] sm:$0xff]  }
0x2985   :  { %v4331_v63 = vpop.eup %4330 }
0x2986   :  { %v1480_v2 = vadd.f32 1.0, %v4331_v63  ;;  %v3585_v63 = vcombine.high %v1532_v55, %v1540_v56 }
0x2988   :  { %4332 = vrcp.f32 %v1480_v2  ;;  %v3587_v2 = vcombine.high %v1533_v21, %v1541_v58 }
0x2992   :  { %v4333_v4 = vpop.eup %4332 }
0x2993   :  { %v1493_v27 = vsub.f32 1.0, %v4333_v4  ;;  %v1502_v0 = vmul.f32 %v4333_v4, %v1500_v26  ;;  %v4118_v26 = vld [vmem:[%s5377_s11 + $0x8] sm:$0xff]  }
0x29e9   :  { %v1484_v5 = vpop.permute.xlu0 %1483 }
0x29ea   :  { %v1486_v6 = vmul.f32 %v4333_v4, %v1484_v5  ;;  %v1518_v4 = vld [vmem:[%s5375_s9 + $0x30] sm:$0xff] }
0x29eb   :  { %v1526_v5 = vld [vmem:[%s5375_s9 + $0x70] sm:$0xff] }
0x29ec   :  { %1488 = vrot.lane.b32.xlu1 %v1486_v6, %s4363_s19  ;;  %v1519_v6 = vld [vmem:[%s5375_s9 + $0x38] sm:$0xff] }
0x29f0   :  { %793 = vrot.lane.b32.xlu1 %v4643_v41, %s4364_s3  ;;  %v1513_v41 = vld [vmem:[%s5375_s9 + $0x8] sm:$0xff] }
0x29f1   :  { %v3562_v17 = vcombine.low %v1513_v41, %v1521_v14  ;;  %v3563_v15 = vcombine.high %v1513_v41, %v1521_v14  ;;  %v1542_v41 = vld [vmem:[%s5375_s9 + $0xf0] sm:$0xff]  ;;  %v3572_v14 = vcombine.low %v1518_v4, %v1526_v5 }
0x29f3   :  { %1832 = vmatprep.subr.bf16.mxu1 %v3563_v15 }
0x29f4   :  { %1833 = vmatpush1.bf16.msra.mxu1 %v3562_v17 }
0x29f5   :  { %1834 = vmatprep.subr.bf16.mxu1 %v3579_v23  ;;  %v4114_v23 = vld [vmem:[%s5377_s11] sm:$0xff]  }
0x29f8   :  { %1835 = vmatpush1.bf16.msra.mxu1 %v3578_v25  ;;  %v4116_v25 = vld [vmem:[%s5377_s11 + $0x48] sm:$0xff]  }
0x29f9   :  { %1914 = vmatprep.subr.bf16.mxu1 %v3567_v29  ;;  %v4131_v29 = vld [vmem:[%s5377_s11 + $0xa0] sm:$0xff]  }
0x2a5e   :  { %v1489_v47 = vpop.permute.xlu1 %1488 }
0x2a5f   :  { %v1491_v7 = vadd.f32 %v1489_v47, %v4667_v60  ;;  %v3560_v60 = vcombine.low %v1512_v12, %v1520_v13  ;;  %v1527_v47 = vld [vmem:[%s5375_s9 + $0x78] sm:$0xff]  ;;  %v1534_v13 = vld [vmem:[%s5375_s9 + $0xb0] sm:$0xff] }
0x2a60   :  { %v3575_v12 = vcombine.high %v1519_v6, %v1527_v47  ;;  %v3574_v16 = vcombine.low %v1519_v6, %v1527_v47  ;;  %v3589_v1 = vcombine.high %v1534_v13, %v1542_v41  ;;  %v3588_v15 = vcombine.low %v1534_v13, %v1542_v41 }
0x2a61   :  { %4334 = vtanh.f32 %v1491_v7  ;;  %1792 = vmatpush1.bf16.msra.mxu0 %v3560_v60  ;;  %v3584_v7 = vcombine.low %v1532_v55, %v1540_v56  ;;  %v1535_v60 = vld [vmem:[%s5375_s9 + $0xb8] sm:$0xff] }
0x2a62   :  { %v794_v9 = vpop.permute.xlu1 %793  ;;  %1793 = vmatprep.subr.bf16.mxu0 %v3577_v18  ;;  %v3591_v17 = vcombine.high %v1535_v60, %v1543_v61  ;;  %v3590_v18 = vcombine.low %v1535_v60, %v1543_v61 }
0x2a63   :  { %797 = vst.msk [vmem:[#allocation3 - $0x6] sm:$0xc0] %vm796_vm12, %v794_v9  ;;  %v3586_v9 = vcombine.low %v1533_v21, %v1541_v58  ;;  %v5004_v58 = vld [vmem:[%s5376_s10] sm:$0xff] }
0x2a65   :  { %1794 = vmatpush1.bf16.msra.mxu0 %v3576_v24  ;;  %v4115_v24 = vld [vmem:[%s5377_s11 + $0x80] sm:$0xff]  }
0x2a66   :  { %1873 = vmatprep.subr.bf16.mxu0 %v3565_v33  ;;  %v4126_v33 = vld [vmem:[%s5377_s11 + $0x18] sm:$0xff]  }
0x2a6b   :  { %v4335_v11 = vpop.eup %4334 }
0x2a6c   :  { %1495 = vrot.lane.b32.xlu0 %v4335_v11, %s4364_s3  ;;  %v3573_v11 = vcombine.high %v1518_v4, %v1526_v5 }
0x2ade   :  { %v1496_v28 = vpop.permute.xlu0 %1495 }
0x2adf   :  { %v1498_v10 = vmul.f32 %v1496_v28, %v1493_v27  ;;  %v4119_v27 = vld [vmem:[%s5377_s11 + $0x88] sm:$0xff]   ;;  %v4120_v28 = vld [vmem:[%s5377_s11 + $0x50] sm:$0xff]  }
0x2ae1   :  { %v1503_v34 = vadd.f32 %v1502_v0, %v1498_v10  ;;  %v4121_v0 = vld [vmem:[%s5377_s11 + $0xd0] sm:$0xff]  }
0x2ae2   :  { %v4122_v10 = vld [vmem:[%s5377_s11 + $0x10] sm:$0xff]  }
0x2ae3   :  { %1505 = vrot.lane.b32.xlu0 %v1503_v34, %s4364_s3  ;;  %v4128_v34 = vld [vmem:[%s5377_s11 + $0x60] sm:$0xff]  }
0x2b55   :  { %v1506_v20 = vpop.permute.xlu0 %1505 }
0x2b56   :  { %1508 = vst.msk [vmem:[#allocation3 - $0x4] sm:$0xc0] %vm796_vm12, %v1506_v20  ;;  %v4132_v20 = vld [vmem:[%s5377_s11 + $0x68] sm:$0xff]  }
0x2b5d   :  { %v1509_v57 = vld [vmem:[#allocation3] sm:$0xf] }
0x2b5e   :  { %v1510_v40 = vmax.f32 %v1509_v57, 0.0  ;;  %v4135_v57 = vld [vmem:[%s5377_s11 + $0xa8] sm:$0xff]  }
0x2b60   :  { %v4812_v42 = vpack.c.bf16 %v1510_v40, %v1510_v40  ;;  %v4138_v40 = vld [vmem:[%s5377_s11 + $0x30] sm:$0xff]  }
0x2b62   :  { %3592 = vmatmul.mubr.msk.bf16.vlgmr.msra.gmra.mrb[36].mxu0 %vm129_vm4, %v4812_v42  ;;  %3593 = vmatmul.mubr.msk.bf16.vlgmr.msra.gmra.mrb[36].mxu1 %vm129_vm4, %v4812_v42 }
0x2b63   :  { %1874 = vmatpush1.bf16.msra.mxu0 %v3564_v54  ;;  %1915 = vmatpush1.bf16.msra.mxu1 %v3566_v35  ;;  %v4129_v54 = vld [vmem:[%s5377_s11 + $0xe0] sm:$0xff]  }
0x2b64   :  { %1875 = vmatprep.subr.bf16.mxu0 %v3581_v43  ;;  %1916 = vmatprep.subr.bf16.mxu1 %v3583_v44  ;;  %v4130_v35 = vld [vmem:[%s5377_s11 + $0x20] sm:$0xff]   ;;  %v4140_v43 = vld [vmem:[%s5377_s11 + $0x78] sm:$0xff]  }
0x2b65   :  { %1905 = vmatprep.mubr.bf16.mxu0 %v4362_v8  ;;  %1946 = vmatprep.mubr.bf16.mxu1 %v4362_v8  ;;  %v4141_v44 = vld [vmem:[%s5377_s11 + $0xf8] sm:$0xff]  }
0x2b67   :  { %1876 = vmatpush1.bf16.msra.mxu0 %v3580_v50  ;;  %1917 = vmatpush1.bf16.msra.mxu1 %v3582_v51  ;;  %v1548_v50 = vlaneseq }
0x2b68   :  { %1955 = vmatprep.subr.bf16.mxu0 %v3569_v52  ;;  %1996 = vmatprep.subr.bf16.mxu1 %v3571_v53  ;;  %v4992_v53 = vld [vmem:[%s5376_s10 + $0x8] sm:$0xff] }
0x2b69   :  { %v4986_v51 = vshrl.u32 %v1548_v50, 7  ;;  %v4156_v50 = vld [vmem:[%s5377_s11 + $0x158] sm:$0xff]  }
0x2b6a   :  { %3594 = vmatmul.mubr.msk.bf16.vlgmr.msra.gmra.mrb[40].mxu0 %vm129_vm4, %v4812_v42  ;;  %3595 = vmatmul.mubr.msk.bf16.vlgmr.msra.gmra.mrb[40].mxu1 %vm129_vm4, %v4812_v42 }
0x2b6b   :  { %1956 = vmatpush1.bf16.msra.mxu0 %v3568_v59  ;;  %1997 = vmatpush1.bf16.msra.mxu1 %v3570_v62  ;;  %v1574_v52 = vsub.s32 6, %v4986_v51  ;;  %v1550_v56 = vsub.s32 0, %v4986_v51  ;;  %v1558_v21 = vsub.s32 2, %v4986_v51  ;;  %v1554_v59 = vsub.s32 1, %v4986_v51 }
0x2b6c   :  { %1957 = vmatprep.subr.bf16.mxu0 %v3585_v63  ;;  %1998 = vmatprep.subr.bf16.mxu1 %v3587_v2  ;;  %v1562_v62 = vsub.s32 3, %v4986_v51 }
0x2b6d   :  { %1987 = vmatprep.mubr.bf16.mxu0 %v4362_v8  ;;  %2028 = vmatprep.mubr.bf16.mxu1 %v4362_v8  ;;  %v4997_v55 = vrot.slane %v4992_v53, %v1574_v52  ;;  %v1551_v63 = vrot.slane %v5004_v58, %v1550_v56  ;;  %v1559_v2 = vrot.slane %v5004_v58, %v1558_v21 }
0x2b6e   :  { %v1555_v4 = vrot.slane %v5004_v58, %v1554_v59  ;;  %v1563_v5 = vrot.slane %v5004_v58, %v1562_v62 }
0x2b6f   :  { %1958 = vmatpush1.bf16.msra.mxu0 %v3584_v7  ;;  %1999 = vmatpush1.bf16.msra.mxu1 %v3586_v9 }
0x2b70   :  { %2037 = vmatprep.subr.bf16.mxu0 %v3573_v11  ;;  %2078 = vmatprep.subr.bf16.mxu1 %v3575_v12 }
0x2b72   :  { %3596 = vmatmul.mubr.msk.bf16.vlgmr.msra.gmra.mrb[44].mxu0 %vm129_vm4, %v4812_v42  ;;  %3597 = vmatmul.mubr.msk.bf16.vlgmr.msra.gmra.mrb[44].mxu1 %vm129_vm4, %v4812_v42 }
0x2b73   :  { %2038 = vmatpush1.bf16.msra.mxu0 %v3572_v14  ;;  %2079 = vmatpush1.bf16.msra.mxu1 %v3574_v16  ;;  %v1570_v14 = vsub.s32 5, %v4986_v51  ;;  %v1578_v16 = vsub.s32 7, %v4986_v51 }
0x2b74   :  { %2039 = vmatprep.subr.bf16.mxu0 %v3589_v1  ;;  %2080 = vmatprep.subr.bf16.mxu1 %v3591_v17 }
0x2b75   :  { %2069 = vmatprep.mubr.bf16.mxu0 %v4362_v8  ;;  %2110 = vmatprep.mubr.bf16.mxu1 %v4362_v8  ;;  %v4117_v8 = vld [vmem:[%s5377_s11 + $0xc8] sm:$0xff]  }
0x2b77   :  { %2040 = vmatpush1.bf16.msra.mxu0 %v3588_v15  ;;  %2081 = vmatpush1.bf16.msra.mxu1 %v3590_v18 }
0x2b78   :  { %3782 = vmatprep.subr.bf16.mxu0 %v4112_v19  ;;  %3804 = vmatprep.subr.bf16.mxu1 %v4113_v22 }
0x2b7a   :  { %3598 = vmatmul.mubr.msk.bf16.vlgmr.msra.gmra.mrb[48].mxu0 %vm129_vm4, %v4812_v42  ;;  %3599 = vmatmul.mubr.msk.bf16.vlgmr.msra.gmra.mrb[48].mxu1 %vm129_vm4, %v4812_v42  ;;  %v4139_v42 = vld [vmem:[%s5377_s11 + $0xb0] sm:$0xff]  }
0x2b7b   :  { %3783 = vmatpush3.bf16.msra.mxu0 %v4114_v23  ;;  %3805 = vmatpush3.bf16.msra.mxu1 %v4115_v24 }
0x2b7c   :  { %3784 = vmatprep.subr.bf16.mxu0 %v4116_v25  ;;  %3806 = vmatprep.subr.bf16.mxu1 %v4117_v8  ;;  %v1571_v25 = vrot.slane %v5004_v58, %v1570_v14  ;;  %v1579_v8 = vrot.slane %v5004_v58, %v1578_v16 }
0x2b7f   :  { %3785 = vmatpush3.bf16.msra.mxu0 %v4118_v26  ;;  %3807 = vmatpush3.bf16.msra.mxu1 %v4119_v27  ;;  %v4146_v26 = vld [vmem:[%s5377_s11 + $0x100] sm:$0xff]  }
0x2b80   :  { %3786 = vmatprep.subr.bf16.mxu0 %v4120_v28  ;;  %3808 = vmatprep.subr.bf16.mxu1 %v4121_v0  ;;  %v4147_v27 = vld [vmem:[%s5377_s11 + $0x180] sm:$0xff]  }
0x2b83   :  { %3787 = vmatpush3.bf16.msra.mxu0 %v4122_v10  ;;  %3809 = vmatpush3.bf16.msra.mxu1 %v4123_v30  ;;  %v4148_v10 = vld [vmem:[%s5377_s11 + $0x148] sm:$0xff]  }
0x2b84   :  { %3788 = vmatprep.subr.bf16.mxu0 %v4124_v31  ;;  %3810 = vmatprep.subr.bf16.mxu1 %v4125_v32  ;;  %v4149_v30 = vld [vmem:[%s5377_s11 + $0x1c8] sm:$0xff]  }
0x2b87   :  { %3789 = vmatpush3.bf16.msra.mxu0 %v4126_v33  ;;  %3811 = vmatpush3.bf16.msra.mxu1 %v4127_v3 }
0x2b88   :  { %3790 = vmatprep.subr.bf16.mxu0 %v4128_v34  ;;  %3812 = vmatprep.subr.bf16.mxu1 %v4129_v54 }
0x2b8b   :  { %3791 = vmatpush3.bf16.msra.mxu0 %v4130_v35  ;;  %3813 = vmatpush3.bf16.msra.mxu1 %v4131_v29 }
0x2b8c   :  { %3792 = vmatprep.subr.bf16.mxu0 %v4132_v20  ;;  %3814 = vmatprep.subr.bf16.mxu1 %v4133_v36  ;;  %v4150_v20 = vld [vmem:[%s5377_s11 + $0x108] sm:$0xff]  }
0x2b8d   :  { %v4151_v36 = vld [vmem:[%s5377_s11 + $0x188] sm:$0xff]  }
0x2b8f   :  { %3793 = vmatpush3.bf16.msra.mxu0 %v4134_v37  ;;  %3815 = vmatpush3.bf16.msra.mxu1 %v4135_v57 }
0x2b90   :  { %3794 = vmatprep.subr.bf16.mxu0 %v4136_v38  ;;  %3816 = vmatprep.subr.bf16.mxu1 %v4137_v39  ;;  %v4152_v38 = vld [vmem:[%s5377_s11 + $0x150] sm:$0xff]  }
0x2b91   :  { %v4153_v39 = vld [vmem:[%s5377_s11 + $0x1d0] sm:$0xff]  }
0x2b93   :  { %3795 = vmatpush3.bf16.msra.mxu0 %v4138_v40  ;;  %3817 = vmatpush3.bf16.msra.mxu1 %v4139_v42 }
0x2b94   :  { %3796 = vmatprep.subr.bf16.mxu0 %v4140_v43  ;;  %3818 = vmatprep.subr.bf16.mxu1 %v4141_v44  ;;  %v1583_v43 = vrot.slane %v4992_v53, %v1550_v56  ;;  %v1591_v44 = vrot.slane %v4992_v53, %v1558_v21  ;;  %v4157_v56 = vld [vmem:[%s5377_s11 + $0x1d8] sm:$0xff]  }
0x2b97   :  { %3797 = vmatpush3.bf16.msra.mxu0 %v4142_v45  ;;  %3819 = vmatpush3.bf16.msra.mxu1 %v4143_v46 }
0x2b98   :  { %3826 = vmatprep.subr.bf16.mxu0 %v4144_v48  ;;  %3848 = vmatprep.subr.bf16.mxu1 %v4145_v49  ;;  %v4154_v48 = vld [vmem:[%s5377_s11 + $0x110] sm:$0xff]  }
0x2b99   :  { %v4155_v49 = vld [vmem:[%s5377_s11 + $0x190] sm:$0xff]  }
0x2c35   :  { %v1825_v6 = vpop.f32.mrb[36].mxu0  ;;  %v1866_v47 = vpop.f32.mrb[36].mxu1 }
0x2c36   :  { %v1826_v7 = vadd.f32 %v1825_v6, %v1551_v63  ;;  %v1867_v9 = vadd.f32 %v1866_v47, %v1559_v2  ;;  %v1827_v11 = vpop.f32.mrb[37].mxu0  ;;  %v1868_v12 = vpop.f32.mrb[37].mxu1 }
0x2c37   :  { %v1828_v13 = vadd.f32 %v1827_v11, %v1555_v4  ;;  %v1869_v41 = vadd.f32 %v1868_v12, %v1563_v5  ;;  %v1829_v60 = vpop.f32.mrb[38].mxu0  ;;  %v1870_v61 = vpop.f32.mrb[38].mxu1  ;;  %v4159_v11 = vld [vmem:[%s5377_s11 + $0x198] sm:$0xff]   ;;  %v1566_v12 = vsub.s32 4, %v4986_v51 }
0x2c38   :  { %v2119_v1 = vmax.f32 %v1826_v7, 0.0  ;;  %v2121_v17 = vmax.f32 %v1867_v9, 0.0  ;;  %v1830_v15 = vpop.f32.mrb[39].mxu0  ;;  %v1871_v18 = vpop.f32.mrb[39].mxu1  ;;  %v4158_v9 = vld [vmem:[%s5377_s11 + $0x118] sm:$0xff]   ;;  %v4160_v60 = vld [vmem:[%s5377_s11 + $0x160] sm:$0xff]  }
0x2c39   :  { %v2120_v19 = vmax.f32 %v1828_v13, 0.0  ;;  %v2122_v22 = vmax.f32 %v1869_v41, 0.0  ;;  %v4161_v61 = vld [vmem:[%s5377_s11 + $0x1e0] sm:$0xff]   ;;  %v4164_v18 = vld [vmem:[%s5377_s11 + $0x168] sm:$0xff]   ;;  %v4205_v51 = vld [vmem:[%s5377_s11 + $0x2f8] sm:$0xff]  }
0x2c3a   :  { %v2135_v28 = vpack.c.bf16 %v2119_v1, %v2119_v1  ;;  %v2137_v0 = vpack.c.bf16 %v2121_v17, %v2121_v17  ;;  %v1599_v1 = vrot.slane %v4992_v53, %v1566_v12  ;;  %v4162_v17 = vld [vmem:[%s5377_s11 + $0x120] sm:$0xff]  }
0x2c3b   :  { %v2136_v23 = vpack.c.bf16 %v2120_v19, %v2120_v19  ;;  %v2138_v24 = vpack.c.bf16 %v2122_v22, %v2122_v22  ;;  %v4163_v15 = vld [vmem:[%s5377_s11 + $0x1a0] sm:$0xff]   ;;  %v4165_v19 = vld [vmem:[%s5377_s11 + $0x1e8] sm:$0xff]  }
0x2c3d   :  { %v5036_v31 = vpop.f32.mrb[40].mxu0  ;;  %v5038_v32 = vpop.f32.mrb[40].mxu1  ;;  %3214 = vmatprep.mubr.bf16.mxu0 %v2136_v23  ;;  %3254 = vmatprep.mubr.bf16.mxu1 %v2138_v24 }
0x2c3e   :  { %v1909_v33 = vpop.f32.mrb[41].mxu0  ;;  %v1950_v3 = vpop.f32.mrb[41].mxu1  ;;  %3215 = vmatmul.mubr.bf16.vlgmr.msra.gmra.mrb[52].mxu0 %v2135_v28  ;;  %3255 = vmatmul.mubr.bf16.vlgmr.msra.gmra.mrb[52].mxu1 %v2137_v0  ;;  %v4166_v0 = vld [vmem:[%s5377_s11 + $0x128] sm:$0xff]  }
0x2c3f   :  { %v1910_v34 = vadd.f32 %v1909_v33, %v1571_v25  ;;  %v1951_v54 = vadd.f32 %v1950_v3, %v1579_v8  ;;  %3827 = vmatpush3.bf16.msra.mxu0 %v4146_v26  ;;  %3849 = vmatpush3.bf16.msra.mxu1 %v4147_v27  ;;  %v1911_v35 = vpop.f32.mrb[42].mxu0  ;;  %v1952_v29 = vpop.f32.mrb[42].mxu1 }
0x2c40   :  { %v1912_v37 = vpop.f32.mrb[43].mxu0  ;;  %v1953_v57 = vpop.f32.mrb[43].mxu1  ;;  %3828 = vmatprep.subr.bf16.mxu0 %v4148_v10  ;;  %3850 = vmatprep.subr.bf16.mxu1 %v4149_v30  ;;  %v4167_v10 = vld [vmem:[%s5377_s11 + $0x1a8] sm:$0xff]   ;;  %v1567_v30 = vrot.slane %v5004_v58, %v1566_v12  ;;  %v1587_v35 = vrot.slane %v4992_v53, %v1554_v59  ;;  %v4171_v29 = vld [vmem:[%s5377_s11 + $0x1b0] sm:$0xff]   ;;  %v4172_v59 = vld [vmem:[%s5377_s11 + $0x178] sm:$0xff]  }
0x2c41   :  { %v2124_v40 = vmax.f32 %v1910_v34, 0.0  ;;  %v2126_v42 = vmax.f32 %v1951_v54, 0.0  ;;  %v4168_v34 = vld [vmem:[%s5377_s11 + $0x170] sm:$0xff]   ;;  %v4188_v12 = vld [vmem:[%s5377_s11 + $0x258] sm:$0xff]  }
0x2c42   :  { %v4169_v54 = vld [vmem:[%s5377_s11 + $0x1f0] sm:$0xff]  }
0x2c43   :  { %v2140_v45 = vpack.c.bf16 %v2124_v40, %v2124_v40  ;;  %v2142_v46 = vpack.c.bf16 %v2126_v42, %v2126_v42  ;;  %3829 = vmatpush3.bf16.msra.mxu0 %v4150_v20  ;;  %3851 = vmatpush3.bf16.msra.mxu1 %v4151_v36  ;;  %v1908_v20 = vadd.f32 %v5036_v31, %v1567_v30  ;;  %v4174_v31 = vld [vmem:[%s5377_s11 + $0x138] sm:$0xff]   ;;  %v4176_v40 = vld [vmem:[%s5377_s11 + $0x240] sm:$0xff]   ;;  %v4202_v30 = vld [vmem:[%s5377_s11 + $0x230] sm:$0xff]  }
0x2c44   :  { %3830 = vmatprep.subr.bf16.mxu0 %v4152_v38  ;;  %3852 = vmatprep.subr.bf16.mxu1 %v4153_v39  ;;  %v4177_v42 = vld [vmem:[%s5377_s11 + $0x2c0] sm:$0xff]  }
0x2c45   :  { %v1989_v21 = vpop.f32.mrb[44].mxu0  ;;  %v2030_v63 = vpop.f32.mrb[44].mxu1  ;;  %3294 = vmatprep.mubr.bf16.mxu0 %v2140_v45  ;;  %3334 = vmatprep.mubr.bf16.mxu1 %v2142_v46  ;;  %v2123_v38 = vmax.f32 %v1908_v20, 0.0  ;;  %v4178_v45 = vld [vmem:[%s5377_s11 + $0x200] sm:$0xff]   ;;  %v4212_v20 = vld [vmem:[%s5377_s11 + $0x348] sm:$0xff]  }
0x2c46   :  { %v5066_v2 = vadd.f32 %v1989_v21, %v1583_v43  ;;  %v5068_v4 = vadd.f32 %v2030_v63, %v1591_v44  ;;  %v1991_v5 = vpop.f32.mrb[45].mxu0  ;;  %v2032_v6 = vpop.f32.mrb[45].mxu1  ;;  %v4181_v21 = vld [vmem:[%s5377_s11 + $0x2c8] sm:$0xff]  }
0x2c47   :  { %3831 = vmatpush3.bf16.msra.mxu0 %v4154_v48  ;;  %3853 = vmatpush3.bf16.msra.mxu1 %v4155_v49  ;;  %v1993_v47 = vpop.f32.mrb[46].mxu0  ;;  %v2034_v7 = vpop.f32.mrb[46].mxu1  ;;  %v1992_v37 = vadd.f32 %v1991_v5, %v1587_v35  ;;  %v2139_v46 = vpack.c.bf16 %v2123_v38, %v2123_v38  ;;  %v4179_v49 = vld [vmem:[%s5377_s11 + $0x280] sm:$0xff]   ;;  %v4182_v5 = vld [vmem:[%s5377_s11 + $0x208] sm:$0xff]   ;;  %v4218_v38 = vld [vmem:[%s5377_s11 + $0x310] sm:$0xff]  }
0x2c48   :  { %v1994_v13 = vpop.f32.mrb[47].mxu0  ;;  %v2035_v41 = vpop.f32.mrb[47].mxu1  ;;  %3832 = vmatprep.subr.bf16.mxu0 %v4156_v50  ;;  %3854 = vmatprep.subr.bf16.mxu1 %v4157_v56  ;;  %v4180_v56 = vld [vmem:[%s5377_s11 + $0x248] sm:$0xff]   ;;  %v4184_v47 = vld [vmem:[%s5377_s11 + $0x250] sm:$0xff]  }
0x2c49   :  { %v2128_v43 = vmax.f32 %v1992_v37, 0.0  ;;  %v4185_v7 = vld [vmem:[%s5377_s11 + $0x2d0] sm:$0xff]   ;;  %v4189_v13 = vld [vmem:[%s5377_s11 + $0x2d8] sm:$0xff]   ;;  %v4214_v37 = vld [vmem:[%s5377_s11 + $0x308] sm:$0xff]  }
0x2c4a   :  { %v4190_v41 = vld [vmem:[%s5377_s11 + $0x218] sm:$0xff]  }
0x2c4b   :  { %3833 = vmatpush3.bf16.msra.mxu0 %v4158_v9  ;;  %3855 = vmatpush3.bf16.msra.mxu1 %v4159_v11  ;;  %v2144_v50 = vpack.c.bf16 %v2128_v43, %v2128_v43  ;;  %v4186_v9 = vld [vmem:[%s5377_s11 + $0x210] sm:$0xff]   ;;  %v4222_v43 = vld [vmem:[%s5377_s11 + $0x318] sm:$0xff]  }
0x2c4c   :  { %3834 = vmatprep.subr.bf16.mxu0 %v4160_v60  ;;  %3856 = vmatprep.subr.bf16.mxu1 %v4161_v61  ;;  %v4187_v11 = vld [vmem:[%s5377_s11 + $0x290] sm:$0xff]   ;;  %v4191_v60 = vld [vmem:[%s5377_s11 + $0x298] sm:$0xff]   ;;  %v4192_v61 = vld [vmem:[%s5377_s11 + $0x260] sm:$0xff]  }
0x2c4d   :  { %v2071_v22 = vpop.f32.mrb[48].mxu0  ;;  %v2112_v23 = vpop.f32.mrb[48].mxu1 }
0x2c4e   :  { %v5096_v24 = vadd.f32 %v2071_v22, %v1599_v1  ;;  %v5099_v25 = vadd.f32 %v2112_v23, %v4997_v55  ;;  %v5101_v8 = vpop.f32.mrb[49].mxu0  ;;  %v5103_v26 = vpop.f32.mrb[49].mxu1  ;;  %v1575_v55 = vrot.slane %v5004_v58, %v1574_v52  ;;  %v1595_v52 = vrot.slane %v4992_v53, %v1562_v62  ;;  %v4170_v58 = vld [vmem:[%s5377_s11 + $0x130] sm:$0xff]   ;;  %v4173_v62 = vld [vmem:[%s5377_s11 + $0x1f8] sm:$0xff]   ;;  %v4193_v1 = vld [vmem:[%s5377_s11 + $0x2e0] sm:$0xff]  }
0x2c4f   :  { %3835 = vmatpush3.bf16.msra.mxu0 %v4162_v17  ;;  %3857 = vmatpush3.bf16.msra.mxu1 %v4163_v15  ;;  %v2075_v27 = vpop.f32.mrb[50].mxu0  ;;  %v2116_v28 = vpop.f32.mrb[50].mxu1  ;;  %v4194_v17 = vld [vmem:[%s5377_s11 + $0x220] sm:$0xff]   ;;  %v4198_v22 = vld [vmem:[%s5377_s11 + $0x228] sm:$0xff]  }
0x2c50   :  { %v2076_v33 = vpop.f32.mrb[51].mxu0  ;;  %v2117_v3 = vpop.f32.mrb[51].mxu1  ;;  %3836 = vmatprep.subr.bf16.mxu0 %v4164_v18  ;;  %3858 = vmatprep.subr.bf16.mxu1 %v4165_v19  ;;  %v1949_v36 = vadd.f32 %v5038_v32, %v1575_v55  ;;  %v2033_v57 = vadd.f32 %v2032_v6, %v1595_v52  ;;  %v4175_v32 = vld [vmem:[%s5377_s11 + $0x1b8] sm:$0xff]   ;;  %v4183_v6 = vld [vmem:[%s5377_s11 + $0x288] sm:$0xff]   ;;  %v4195_v15 = vld [vmem:[%s5377_s11 + $0x2a0] sm:$0xff]  }
0x2c51   :  { %v4196_v18 = vld [vmem:[%s5377_s11 + $0x268] sm:$0xff]   ;;  %v4200_v27 = vld [vmem:[%s5377_s11 + $0x270] sm:$0xff]   ;;  %v4204_v33 = vld [vmem:[%s5377_s11 + $0x278] sm:$0xff]   ;;  %v2127_v3 = vmax.f32 %v5066_v2, 0.0 }
0x2c52   :  { %v2125_v39 = vmax.f32 %v1949_v36, 0.0  ;;  %v2130_v44 = vmax.f32 %v2033_v57, 0.0  ;;  %v4197_v19 = vld [vmem:[%s5377_s11 + $0x2e8] sm:$0xff]   ;;  %v4201_v28 = vld [vmem:[%s5377_s11 + $0x2f0] sm:$0xff]   ;;  %v4210_v2 = vld [vmem:[%s5377_s11 + $0x300] sm:$0xff]  }
0x2c53   :  { %3837 = vmatpush3.bf16.msra.mxu0 %v4166_v0  ;;  %3859 = vmatpush3.bf16.msra.mxu1 %v4167_v10  ;;  %v4199_v23 = vld [vmem:[%s5377_s11 + $0x2a8] sm:$0xff]   ;;  %v1603_v0 = vrot.slane %v4992_v53, %v1570_v14  ;;  %v1611_v10 = vrot.slane %v4992_v53, %v1578_v16  ;;  %v4203_v55 = vld [vmem:[%s5377_s11 + $0x2b0] sm:$0xff]   ;;  %v4206_v16 = vld [vmem:[%s5377_s11 + $0x238] sm:$0xff]  }
0x2c54   :  { %3838 = vmatprep.subr.bf16.mxu0 %v4168_v34  ;;  %3860 = vmatprep.subr.bf16.mxu1 %v4169_v54  ;;  %v2141_v48 = vpack.c.bf16 %v2125_v39, %v2125_v39  ;;  %v2146_v63 = vpack.c.bf16 %v2130_v44, %v2130_v44  ;;  %v4207_v34 = vld [vmem:[%s5377_s11 + $0x2b8] sm:$0xff]   ;;  %v4208_v54 = vld [vmem:[%s5377_s11 + $0x340] sm:$0xff]   ;;  %v4215_v57 = vld [vmem:[%s5377_s11 + $0x388] sm:$0xff]  }
0x2c55   :  { %v2074_v53 = vadd.f32 %v5101_v8, %v1603_v0  ;;  %v2115_v14 = vadd.f32 %v5103_v26, %v1611_v10  ;;  %v2129_v8 = vmax.f32 %v5068_v4, 0.0  ;;  %v4209_v26 = vld [vmem:[%s5377_s11 + $0x3c0] sm:$0xff]   ;;  %v4219_v39 = vld [vmem:[%s5377_s11 + $0x390] sm:$0xff]   ;;  %v4223_v44 = vld [vmem:[%s5377_s11 + $0x398] sm:$0xff]  }
0x2c57   :  { %3839 = vmatpush3.bf16.msra.mxu0 %v4170_v58  ;;  %3861 = vmatpush3.bf16.msra.mxu1 %v4171_v29  ;;  %v2132_v35 = vmax.f32 %v2074_v53, 0.0  ;;  %v2134_v52 = vmax.f32 %v2115_v14, 0.0  ;;  %v2143_v58 = vpack.c.bf16 %v2127_v3, %v2127_v3  ;;  %v4211_v29 = vld [vmem:[%s5377_s11 + $0x380] sm:$0xff]   ;;  %v2145_v4 = vpack.c.bf16 %v2129_v8, %v2129_v8 }
0x2c58   :  { %3840 = vmatprep.subr.bf16.mxu0 %v4172_v59  ;;  %3862 = vmatprep.subr.bf16.mxu1 %v4173_v62  ;;  %v4213_v59 = vld [vmem:[%s5377_s11 + $0x3c8] sm:$0xff]  }
0x2c59   :  { %v2148_v36 = vpack.c.bf16 %v2132_v35, %v2132_v35  ;;  %v2150_v62 = vpack.c.bf16 %v2134_v52, %v2134_v52 }
0x2c5b   :  { %3841 = vmatpush3.bf16.msra.mxu0 %v4174_v31  ;;  %3863 = vmatpush3.bf16.msra.mxu1 %v4175_v32  ;;  %v4216_v31 = vld [vmem:[%s5377_s11 + $0x350] sm:$0xff]  }
0x2c5c   :  { %3870 = vmatprep.subr.bf16.mxu0 %v4176_v40  ;;  %3892 = vmatprep.subr.bf16.mxu1 %v4177_v42  ;;  %v4217_v32 = vld [vmem:[%s5377_s11 + $0x3d0] sm:$0xff]   ;;  %v4220_v40 = vld [vmem:[%s5377_s11 + $0x358] sm:$0xff]  }
0x2c5d   :  { %v4221_v42 = vld [vmem:[%s5377_s11 + $0x3d8] sm:$0xff]  }
0x2c5e   :  { %3295 = vmatmul.mubr.bf16.vlgmr.msra.gmra.mrb[56].mxu0 %v2139_v46  ;;  %3335 = vmatmul.mubr.bf16.vlgmr.msra.gmra.mrb[56].mxu1 %v2141_v48  ;;  %v4225_v46 = vld [vmem:[%s5377_s11 + $0x3e0] sm:$0xff]  }
0x2c5f   :  { %3871 = vmatpush3.bf16.msra.mxu0 %v4178_v45  ;;  %3374 = vmatprep.mubr.bf16.mxu0 %v2144_v50  ;;  %v4224_v45 = vld [vmem:[%s5377_s11 + $0x360] sm:$0xff]   ;;  %v4228_v50 = vld [vmem:[%s5377_s11 + $0x368] sm:$0xff]  }
0x2c60   :  { %3893 = vmatpush3.bf16.msra.mxu1 %v4179_v49  ;;  %3414 = vmatprep.mubr.bf16.mxu1 %v2146_v63  ;;  %v4226_v48 = vld [vmem:[%s5377_s11 + $0x320] sm:$0xff]   ;;  %v4231_v63 = vld [vmem:[%s5377_s11 + $0x3a8] sm:$0xff]  }
0x2c61   :  { %3872 = vmatprep.subr.bf16.mxu0 %v4180_v56  ;;  %3894 = vmatprep.subr.bf16.mxu1 %v4181_v21  ;;  %v4227_v49 = vld [vmem:[%s5377_s11 + $0x3a0] sm:$0xff]   ;;  %v4229_v56 = vld [vmem:[%s5377_s11 + $0x3e8] sm:$0xff]  }
0x2c62   :  { %v4230_v21 = vld [vmem:[%s5377_s11 + $0x328] sm:$0xff]  }
0x2c63   :  { %3873 = vmatpush3.bf16.msra.mxu0 %v4182_v5  ;;  %v4232_v5 = vld [vmem:[%s5377_s11 + $0x370] sm:$0xff]  }
0x2c64   :  { %3895 = vmatpush3.bf16.msra.mxu1 %v4183_v6  ;;  %3874 = vmatprep.subr.bf16.mxu0 %v4184_v47  ;;  %v4233_v6 = vld [vmem:[%s5377_s11 + $0x3f0] sm:$0xff]  }
0x2c65   :  { %3896 = vmatprep.subr.bf16.mxu1 %v4185_v7  ;;  %v4234_v47 = vld [vmem:[%s5377_s11 + $0x330] sm:$0xff]  }
0x2c66   :  { %v4235_v7 = vld [vmem:[%s5377_s11 + $0x3b0] sm:$0xff]  }
0x2c67   :  { %3875 = vmatpush3.bf16.msra.mxu0 %v4186_v9  ;;  %v4236_v9 = vld [vmem:[%s5377_s11 + $0x378] sm:$0xff]  }
0x2c68   :  { %3897 = vmatpush3.bf16.msra.mxu1 %v4187_v11  ;;  %3876 = vmatprep.subr.bf16.mxu0 %v4188_v12  ;;  %v4237_v11 = vld [vmem:[%s5377_s11 + $0x3f8] sm:$0xff]  }
0x2c69   :  { %3898 = vmatprep.subr.bf16.mxu1 %v4189_v13  ;;  %v4238_v12 = vld [vmem:[%s5377_s11 + $0x338] sm:$0xff]   ;;  %v2131_v13 = vmax.f32 %v5096_v24, 0.0  ;;  %v3600_v24 = vld [vmem:[%s5378_s12] ss:$0 sm:$0xff] }
0x2c6b   :  { %3877 = vmatpush3.bf16.msra.mxu0 %v4190_v41  ;;  %v4239_v41 = vld [vmem:[%s5377_s11 + $0x3b8] sm:$0xff]   ;;  %s4365_s11 = smov [#allocation4]  }
0x2c6c   :  { %3899 = vmatpush3.bf16.msra.mxu1 %v4191_v60  ;;  %3878 = vmatprep.subr.bf16.mxu0 %v4192_v61  ;;  %v2133_v60 = vmax.f32 %v5099_v25, 0.0  ;;  %v2147_v61 = vpack.c.bf16 %v2131_v13, %v2131_v13  ;;  %s3510_s12 = sshll.u32 %s4365_s11, 4  ;;  %s3511_s12 = int_to_ptr.vmem [resolvable:$true] %s3510_s12 }
0x2c6d   :  { %3900 = vmatprep.subr.bf16.mxu1 %v4193_v1  ;;  %s4336_s8 = scalar_lea.vmem %s3511_s12, 64  ;;  %p4341_p1 = scmp.lt.s32.totalorder %s3511_s12, %s3511_s12 }
0x2c6e   :  { %v2149_v1 = vpack.c.bf16 %v2133_v60, %v2133_v60  ;;  %p4337_p0 = scmp.ne.s32.totalorder %s3511_s12, %s4336_s8  ;;  %p4342_p2 = scmp.lt.s32.totalorder %s4336_s8, %s4336_s8 }
0x2c6f   :  { %3879 = vmatpush3.bf16.msra.mxu0 %v4194_v17 }
0x2c70   :  { %3901 = vmatpush3.bf16.msra.mxu1 %v4195_v15  ;;  %3880 = vmatprep.subr.bf16.mxu0 %v4196_v18  ;;  %p4343_p3 = por %p4342_p2, %p4341_p1 }
0x2c71   :  { %3902 = vmatprep.subr.bf16.mxu1 %v4197_v19 }
0x2c72   :  { %p4344_p4 = pnand %p4343_p3, %p4337_p0 }
0x2c73   :  { %3881 = vmatpush3.bf16.msra.mxu0 %v4198_v22 }
0x2c74   :  { %3903 = vmatpush3.bf16.msra.mxu1 %v4199_v23  ;;  %3882 = vmatprep.subr.bf16.mxu0 %v4200_v27 }
0x2c75   :  { %3904 = vmatprep.subr.bf16.mxu1 %v4201_v28 }
0x2c77   :  { %3883 = vmatpush3.bf16.msra.mxu0 %v4202_v30 }
0x2c78   :  { %3905 = vmatpush3.bf16.msra.mxu1 %v4203_v55  ;;  %3884 = vmatprep.subr.bf16.mxu0 %v4204_v33 }
0x2c79   :  { %3906 = vmatprep.subr.bf16.mxu1 %v4205_v51 }
0x2c7b   :  { %3885 = vmatpush3.bf16.msra.mxu0 %v4206_v16 }
0x2c7c   :  { %3907 = vmatpush3.bf16.msra.mxu1 %v4207_v34  ;;  %3914 = vmatprep.subr.bf16.mxu0 %v4208_v54 }
0x2c7d   :  { %3936 = vmatprep.subr.bf16.mxu1 %v4209_v26 }
0x2c7e   :  { %3375 = vmatmul.mubr.bf16.vlgmr.msra.gmra.mrb[60].mxu0 %v2143_v58 }
0x2c7f   :  { %3415 = vmatmul.mubr.bf16.vlgmr.msra.gmra.mrb[60].mxu1 %v2145_v4  ;;  %3915 = vmatpush3.bf16.msra.mxu0 %v4210_v2 }
0x2c80   :  { %3454 = vmatprep.mubr.bf16.mxu0 %v2148_v36  ;;  %3937 = vmatpush3.bf16.msra.mxu1 %v4211_v29 }
0x2c81   :  { %3494 = vmatprep.mubr.bf16.mxu1 %v2150_v62  ;;  %3916 = vmatprep.subr.bf16.mxu0 %v4212_v20 }
0x2c82   :  { %3938 = vmatprep.subr.bf16.mxu1 %v4213_v59 }
0x2c83   :  { %3917 = vmatpush3.bf16.msra.mxu0 %v4214_v37 }
0x2c84   :  { %3939 = vmatpush3.bf16.msra.mxu1 %v4215_v57  ;;  %3918 = vmatprep.subr.bf16.mxu0 %v4216_v31 }
0x2c85   :  { %3940 = vmatprep.subr.bf16.mxu1 %v4217_v32 }
0x2c87   :  { %3919 = vmatpush3.bf16.msra.mxu0 %v4218_v38 }
0x2c88   :  { %3941 = vmatpush3.bf16.msra.mxu1 %v4219_v39  ;;  %3920 = vmatprep.subr.bf16.mxu0 %v4220_v40 }
0x2c89   :  { %3942 = vmatprep.subr.bf16.mxu1 %v4221_v42 }
0x2c8b   :  { %3921 = vmatpush3.bf16.msra.mxu0 %v4222_v43 }
0x2c8c   :  { %3943 = vmatpush3.bf16.msra.mxu1 %v4223_v44  ;;  %3922 = vmatprep.subr.bf16.mxu0 %v4224_v45 }
0x2c8d   :  { %3944 = vmatprep.subr.bf16.mxu1 %v4225_v46 }
0x2c8f   :  { %3923 = vmatpush3.bf16.msra.mxu0 %v4226_v48 }
0x2c90   :  { %3945 = vmatpush3.bf16.msra.mxu1 %v4227_v49  ;;  %3924 = vmatprep.subr.bf16.mxu0 %v4228_v50 }
0x2c91   :  { %3946 = vmatprep.subr.bf16.mxu1 %v4229_v56 }
0x2c93   :  { %3925 = vmatpush3.bf16.msra.mxu0 %v4230_v21 }
0x2c94   :  { %3947 = vmatpush3.bf16.msra.mxu1 %v4231_v63  ;;  %3926 = vmatprep.subr.bf16.mxu0 %v4232_v5 }
0x2c95   :  { %3948 = vmatprep.subr.bf16.mxu1 %v4233_v6 }
0x2c97   :  { %3927 = vmatpush3.bf16.msra.mxu0 %v4234_v47 }
0x2c98   :  { %3949 = vmatpush3.bf16.msra.mxu1 %v4235_v7  ;;  %3928 = vmatprep.subr.bf16.mxu0 %v4236_v9 }
0x2c99   :  { %3950 = vmatprep.subr.bf16.mxu1 %v4237_v11 }
0x2c9b   :  { %3929 = vmatpush3.bf16.msra.mxu0 %v4238_v12 }
0x2c9c   :  { %3951 = vmatpush3.bf16.msra.mxu1 %v4239_v41 }
0x2c9e   :  { %3455 = vmatmul.mubr.bf16.vlgmr.msra.gmra.mrb[64].mxu0 %v2147_v61 }
0x2c9f   :  { %3495 = vmatmul.mubr.bf16.vlgmr.msra.gmra.mrb[64].mxu1 %v2149_v1 }
0x2d11   :  { %v3798_v17 = vpop.f32.mrb[52].mxu0  ;;  %v3820_v15 = vpop.f32.mrb[52].mxu1 }
0x2d12   :  { %v3799_v18 = vpop.f32.mrb[53].mxu0  ;;  %v3821_v19 = vpop.f32.mrb[53].mxu1 }
0x2d13   :  { %v3800_v22 = vadd.f32 %v3799_v18, %v3798_v17  ;;  %v3822_v23 = vadd.f32 %v3821_v19, %v3820_v15  ;;  %v3801_v27 = vpop.f32.mrb[54].mxu0  ;;  %v3823_v28 = vpop.f32.mrb[54].mxu1 }
0x2d14   :  { %v3802_v25 = vpop.f32.mrb[55].mxu0  ;;  %v3824_v0 = vpop.f32.mrb[55].mxu1 }
0x2d15   :  { %v3217_v10 = vadd.f32 %v3800_v22, %v3600_v24 }
0x2d17   :  { %v3257_v30 = vadd.f32 %v3822_v23, %v3217_v10 }
0x2d31   :  { %v3842_v55 = vpop.f32.mrb[56].mxu0  ;;  %v3864_v33 = vpop.f32.mrb[56].mxu1 }
0x2d32   :  { %v3843_v51 = vpop.f32.mrb[57].mxu0  ;;  %v3865_v53 = vpop.f32.mrb[57].mxu1 }
0x2d33   :  { %v3844_v14 = vadd.f32 %v3843_v51, %v3842_v55  ;;  %v3866_v16 = vadd.f32 %v3865_v53, %v3864_v33  ;;  %v3845_v3 = vpop.f32.mrb[58].mxu0  ;;  %v3867_v34 = vpop.f32.mrb[58].mxu1 }
0x2d34   :  { %v3846_v54 = vpop.f32.mrb[59].mxu0  ;;  %v3868_v8 = vpop.f32.mrb[59].mxu1 }
0x2d35   :  { %v3297_v26 = vadd.f32 %v3844_v14, %v3257_v30 }
0x2d37   :  { %v3337_v35 = vadd.f32 %v3866_v16, %v3297_v26 }
0x2d51   :  { %v3886_v52 = vpop.f32.mrb[60].mxu0 }
0x2d52   :  { %v3908_v2 = vpop.f32.mrb[60].mxu1  ;;  %v3887_v58 = vpop.f32.mrb[61].mxu0 }
0x2d53   :  { %v3888_v29 = vadd.f32 %v3887_v58, %v3886_v52  ;;  %v3909_v4 = vpop.f32.mrb[61].mxu1  ;;  %v3889_v20 = vpop.f32.mrb[62].mxu0 }
0x2d54   :  { %v3910_v36 = vadd.f32 %v3909_v4, %v3908_v2  ;;  %v3911_v59 = vpop.f32.mrb[62].mxu1  ;;  %v3890_v62 = vpop.f32.mrb[63].mxu0 }
0x2d55   :  { %v3377_v37 = vadd.f32 %v3888_v29, %v3337_v35  ;;  %v3912_v57 = vpop.f32.mrb[63].mxu1 }
0x2d57   :  { %v3417_v31 = vadd.f32 %v3910_v36, %v3377_v37 }
0x2d71   :  { %v3930_v32 = vpop.f32.mrb[64].mxu0 }
0x2d72   :  { %v3952_v38 = vpop.f32.mrb[64].mxu1  ;;  %v3931_v39 = vpop.f32.mrb[65].mxu0 }
0x2d73   :  { %v3932_v40 = vadd.f32 %v3931_v39, %v3930_v32  ;;  %v3953_v42 = vpop.f32.mrb[65].mxu1  ;;  %v3933_v43 = vpop.f32.mrb[66].mxu0 }
0x2d74   :  { %v3954_v44 = vadd.f32 %v3953_v42, %v3952_v38  ;;  %v3955_v45 = vpop.f32.mrb[66].mxu1  ;;  %v3934_v46 = vpop.f32.mrb[67].mxu0 }
0x2d75   :  { %v3457_v48 = vadd.f32 %v3932_v40, %v3417_v31  ;;  %v3956_v49 = vpop.f32.mrb[67].mxu1 }
0x2d77   :  { %v3497_v50 = vadd.f32 %v3954_v44, %v3457_v48 }
0x2d79   :  { %3503 = vst.msk [vmem:[#allocation4] sm:$0xf] %vm3502_vm13, %v3497_v50 }
0x2d7a   :  { %4347 = shalt.err (!%p4344_p4)
}
0x2d7b   :  { %s4348_s28 = scalar_lea.hbm %s5379_s13, 64 }
0x2d7c   :  { %p4349_p5 = scmp.ne.s32.totalorder %s5379_s13, %s4348_s28  ;;  %p4352_p6 = scmp.lt.u32.totalorder %s4348_s28, %s5379_s13 }
0x2d7e   :  { %p4354_p7 = pnand %p4352_p6, %p4349_p5 }
0x2d80   :  { %4357 = shalt.err (!%p4354_p7)
}
0x2d81   :  { %3513 = dma.vmem_to_hbm [thread:$0]  %s3511_s12, 64, %s5379_s13, [#allocation5]  }
0x2d82   :  { %4358 = dma.done.wait [#allocation5], 64  }
0x2d83   :  { %4359 = vsyncadd [#allocation5], 4294967232 }
0x2d84   :  { %3517 = vsyncpa [#allocation5], 1 }

</bundles_post_ra>
